<compile_context>
chip_gen: v7x
topology: tpu7x:2x2x1
jax: 0.10.0
libtpu: 0.0.40
codegen_flags: <defaults>
</compile_context>

<pallas_src>
import jax
import jax.numpy as jnp
from jax.experimental import pallas as pl
from jax.experimental.pallas import tpu as pltpu

IN_H = 32            # input spatial size (must be 32 so flatten -> 2*2*64 = mlp1 in)
IN_W = 32
IN_C = 3
N_PAD = 128          # lane padding for the MLP head outputs

# (kernel, stride, pad) per conv layer; channel counts come from the params.
CONV_CFG = ((3, 2, 1), (3, 2, 1), (3, 2, 1), (2, 2, 0))


# ---------------------------------------------------------------------------
# Kernel: the whole network for ONE sample, everything resident in VMEM/vregs.
# ---------------------------------------------------------------------------
def _conv_block(a, s_ref, w_ref, b_ref):
    """a: (h_in, Win*Cin) bf16 -> (h_out, Wout*Cout) f32  (conv + BN + ReLU).

    s_ref: (KH, h_out, h_in) bf16 precomputed 0/1 vertical row-selection
           (implements vertical stride + zero padding exactly).
    w_ref: (KH, Win*Cin, Wout*Cout) bf16 folded weights (horizontal taps,
           stride/pad, conv bias scale and BN folded in).
    b_ref: (1, Wout*Cout) f32 folded bias row.
    """
    kh = w_ref.shape[0]
    h_out = s_ref.shape[1]
    n_out = w_ref.shape[-1]
    acc = jnp.zeros((h_out, n_out), jnp.float32)
    for i in range(kh):                       # static unroll over vertical taps
        rows = jnp.dot(s_ref[i], a, preferred_element_type=jnp.float32)
        acc = acc + jnp.dot(rows.astype(jnp.bfloat16), w_ref[i],
                            preferred_element_type=jnp.float32)
    # f32 epilogue: conv bias + BN scale/shift already folded into b_ref/w_ref.
    return jnp.maximum(acc + b_ref[...], 0.0)


def _cnn_kernel(x_ref,
                s1, w1, b1, s2, w2, b2, s3, w3, b3, s4, w4, b4,
                wm1, bm1, wm2, bm2, o_ref):
    a = x_ref[...].astype(jnp.bfloat16)                      # (32, 96)
    a = _conv_block(a, s1, w1, b1)                           # (16, 256)
    a = _conv_block(a.astype(jnp.bfloat16), s2, w2, b2)      # (8, 256)
    a = _conv_block(a.astype(jnp.bfloat16), s3, w3, b3)      # (4, 256)
    a = _conv_block(a.astype(jnp.bfloat16), s4, w4, b4)      # (2, 128)

    # flatten (torch NCHW order) + mlp1, folded into one weight slab per output
    # row of conv4.  No ReLU between the two linears (matches forward()).
    h = (jnp.dot(a[0:1, :].astype(jnp.bfloat16), wm1[0],
                 preferred_element_type=jnp.float32)
         + jnp.dot(a[1:2, :].astype(jnp.bfloat16), wm1[1],
                   preferred_element_type=jnp.float32)
         + bm1[...])                                         # (1, 128)
    out = jnp.dot(h.astype(jnp.bfloat16), wm2[...],
                  preferred_element_type=jnp.float32) + bm2[...]   # (1, 128)
    o_ref[...] = out.astype(o_ref.dtype)


# ---------------------------------------------------------------------------
# Parameter folding (trace-time, pure JAX, constants only)
# ---------------------------------------------------------------------------
def _make_sel(h_in, kh, stride, pad):
    """0/1 vertical row-selection per tap: out row oh reads in row s*oh+i-pad."""
    h_out = (h_in + 2 * pad - kh) // stride + 1
    oh = jnp.arange(h_out)[:, None]
    hi = jnp.arange(h_in)[None, :]
    sels = [(hi == stride * oh + (i - pad)).astype(jnp.bfloat16) for i in range(kh)]
    return jnp.stack(sels, axis=0)            # (kh, h_out, h_in)


def _fold_conv(w, b, gamma, beta, mean, var, eps, w_in, stride, pad):
    """Fold BN(eval) + horizontal taps/stride/pad into per-vertical-tap mats.

    Returns w_mat (KH, Win*Cin, Wout*Cout) bf16 and b_row (1, Wout*Cout) f32,
    where activation columns are indexed w*Cin + c (same layout every layer).
    """
    cout, cin, kh, kw = w.shape
    scale = gamma / jnp.sqrt(var + eps)
    wf = w * scale[:, None, None, None]            # BN scale folded into weights
    bias = (b - mean) * scale + beta               # conv bias + BN shift folded
    w_out = (w_in + 2 * pad - kw) // stride + 1
    wo = jnp.arange(w_out)
    wi = jnp.arange(w_in)
    k = wi[None, :] - (stride * wo[:, None] - pad)          # (Wout, Win) tap idx
    valid = (k >= 0) & (k < kw)
    kc = jnp.clip(k, 0, kw - 1)
    wt = jnp.transpose(wf, (2, 3, 1, 0))                    # (KH, KW, Cin, Cout)
    g = jnp.where(valid[None, :, :, None, None],
                  wt[:, kc, :, :], 0.0)                     # (KH, Wout, Win, Cin, Cout)
    g = jnp.transpose(g, (0, 2, 3, 1, 4))                   # (KH, Win, Cin, Wout, Cout)
    w_mat = g.reshape(kh, w_in * cin, w_out * cout).astype(jnp.bfloat16)
    b_row = jnp.tile(bias, (w_out,)).reshape(1, w_out * cout).astype(jnp.float32)
    return w_mat, b_row


def fold_params(params):
    folded = []
    h_in = IN_H
    w_in = IN_W
    for idx, (k, s, p) in enumerate(CONV_CFG, start=1):
        w, b, gamma, beta, mean, var, eps = params[f"conv{idx}"]
        sel = _make_sel(h_in, k, s, p)
        w_mat, b_row = _fold_conv(w, b, gamma, beta, mean, var, eps, w_in, s, p)
        folded += [sel, w_mat, b_row]
        h_in = (h_in + 2 * p - k) // s + 1
        w_in = (w_in + 2 * p - k) // s + 1

    # mlp1: fold torch's NCHW flatten (flat = c*4 + h*2 + w) into one
    # (2*64, 128) slab per conv4 output row h; pad 100 -> 128 lanes.
    w1 = params["mlp1_w"]                       # (100, 256)
    b1 = params["mlp1_b"]
    n1 = w1.shape[0]
    w1r = w1.reshape(n1, 64, 2, 2)                                 # (n, c, h, w)
    w1h = jnp.transpose(w1r, (2, 3, 1, 0)).reshape(2, 2 * 64, n1)  # [h][w*64+c, n]
    w1h = jnp.pad(w1h, ((0, 0), (0, 0), (0, N_PAD - n1))).astype(jnp.bfloat16)
    b1r = jnp.pad(b1, (0, N_PAD - n1)).reshape(1, N_PAD).astype(jnp.float32)

    # mlp2: (10, 100) -> transposed and zero-padded to (128, 128).
    w2 = params["mlp2_w"]
    b2 = params["mlp2_b"]
    n2, k2 = w2.shape
    w2p = jnp.zeros((N_PAD, N_PAD), jnp.float32).at[:k2, :n2].set(w2.T)
    w2p = w2p.astype(jnp.bfloat16)
    b2r = jnp.pad(b2, (0, N_PAD - n2)).reshape(1, N_PAD).astype(jnp.float32)

    folded += [w1h, b1r, w2p, b2r]
    return tuple(folded)


# ---------------------------------------------------------------------------
# Forward pass wrapper
# ---------------------------------------------------------------------------
def _full_spec(a):
    nd = a.ndim
    return pl.BlockSpec(a.shape, lambda b, _nd=nd: (0,) * _nd)


@jax.jit
def cnn_layer_4_forward(x_nchw, folded):
    B = x_nchw.shape[0]
    # NCHW -> (B, H, W*C): lane index = w*Cin + c (matches folded weight layout)
    x2d = jnp.transpose(x_nchw, (0, 2, 3, 1)).reshape(B, IN_H, IN_W * IN_C)

    out = pl.pallas_call(
        _cnn_kernel,
        out_shape=jax.ShapeDtypeStruct((B, 1, N_PAD), jnp.float32),
        grid=(B,),
        in_specs=[pl.BlockSpec((None, IN_H, IN_W * IN_C), lambda b: (b, 0, 0))]
                 + [_full_spec(a) for a in folded],
        out_specs=pl.BlockSpec((None, 1, N_PAD), lambda b: (b, 0, 0)),
        compiler_params=pltpu.CompilerParams(
            dimension_semantics=("parallel",),
            vmem_limit_bytes=32 * 1024 * 1024,
        ),
    )(x2d, *folded)
    return out.reshape(B, N_PAD)[:, :10]


# ---------------------------------------------------------------------------
# Deterministic synthetic parameters (same structure as the torch module)
# ---------------------------------------------------------------------------
def make_params(key):
    def conv_params(key, cout, cin, kh, kw):
        k1, k2 = jax.random.split(key)
        w = jax.random.normal(k1, (cout, cin, kh, kw), jnp.float32) * 0.1
        b = jax.random.normal(k2, (cout,), jnp.float32) * 0.1
        gamma = jnp.ones((cout,), jnp.float32)
        beta = jnp.zeros((cout,), jnp.float32)
        mean = jnp.zeros((cout,), jnp.float32)
        var = jnp.ones((cout,), jnp.float32)
        return (w, b, gamma, beta, mean, var, 1e-5)

    keys = jax.random.split(key, 6)
    p = {}
    p["conv1"] = conv_params(keys[0], 16, 3, 3, 3)
    p["conv2"] = conv_params(keys[1], 32, 16, 3, 3)
    p["conv3"] = conv_params(keys[2], 64, 32, 3, 3)
    p["conv4"] = conv_params(keys[3], 64, 64, 2, 2)
    k1, k2 = jax.random.split(keys[4])
    p["mlp1_w"] = jax.random.normal(k1, (100, 2 * 2 * 64), jnp.float32) * 0.05
    p["mlp1_b"] = jax.random.normal(k2, (100,), jnp.float32) * 0.05
    k1, k2 = jax.random.split(keys[5])
    p["mlp2_w"] = jax.random.normal(k1, (10, 100), jnp.float32) * 0.05
    p["mlp2_b"] = jax.random.normal(k2, (10,), jnp.float32) * 0.05
    return p


# Pure-JAX reference (f32) for a correctness sanity check.
def reference_forward(x, params):
    def block(x, p, stride, pad):
        w, b, gamma, beta, mean, var, eps = p
        y = jax.lax.conv_general_dilated(
            x, w, window_strides=(stride, stride),
            padding=[(pad, pad), (pad, pad)],
            dimension_numbers=("NCHW", "OIHW", "NCHW"))
        y = y + b[None, :, None, None]
        y = (y - mean[None, :, None, None]) * (
            gamma[None, :, None, None] / jnp.sqrt(var[None, :, None, None] + eps)
        ) + beta[None, :, None, None]
        return jnp.maximum(y, 0.0)

    x = block(x, params["conv1"], 2, 1)
    x = block(x, params["conv2"], 2, 1)
    x = block(x, params["conv3"], 2, 1)
    x = block(x, params["conv4"], 2, 0)
    x = x.reshape(x.shape[0], -1)
    x = x @ params["mlp1_w"].T + params["mlp1_b"]
    x = x @ params["mlp2_w"].T + params["mlp2_b"]
    return x


if __name__ == "__main__":
    key = jax.random.PRNGKey(0)
    k_params, k_input = jax.random.split(key)
    params = make_params(k_params)
    folded = fold_params(params)
    # spatial must be 32 so that 4 stride-2 convs give 2x2x64 = 256 flat features
    x = jax.random.normal(k_input, (2, 3, 32, 32), jnp.float32)
    out = cnn_layer_4_forward(x, folded)
    out = jax.block_until_ready(out)
    assert out.shape == (2, 10), out.shape
    ref = reference_forward(x, params)
    scale = float(jnp.maximum(1.0, jnp.max(jnp.abs(ref))))
    err = float(jnp.max(jnp.abs(out - ref)))
    assert err < 5e-2 * scale, f"mismatch vs f32 reference: max abs err {err}"
    print("KERNEL_OK")
</pallas_src>

<mosaic_0001>
module attributes {stable_mosaic.version = 11 : i64} {
  func.func @_cnn_kernel(%arg0: i32, %arg1: memref<1x32x96xf32, #tpu.memory_space<vmem>>, %arg2: memref<3x16x32xbf16, #tpu.memory_space<vmem>>, %arg3: memref<3x96x256xbf16, #tpu.memory_space<vmem>>, %arg4: memref<1x256xf32, #tpu.memory_space<vmem>>, %arg5: memref<3x8x16xbf16, #tpu.memory_space<vmem>>, %arg6: memref<3x256x256xbf16, #tpu.memory_space<vmem>>, %arg7: memref<1x256xf32, #tpu.memory_space<vmem>>, %arg8: memref<3x4x8xbf16, #tpu.memory_space<vmem>>, %arg9: memref<3x256x256xbf16, #tpu.memory_space<vmem>>, %arg10: memref<1x256xf32, #tpu.memory_space<vmem>>, %arg11: memref<2x2x4xbf16, #tpu.memory_space<vmem>>, %arg12: memref<2x256x128xbf16, #tpu.memory_space<vmem>>, %arg13: memref<1x128xf32, #tpu.memory_space<vmem>>, %arg14: memref<2x128x128xbf16, #tpu.memory_space<vmem>>, %arg15: memref<1x128xf32, #tpu.memory_space<vmem>>, %arg16: memref<128x128xbf16, #tpu.memory_space<vmem>>, %arg17: memref<1x128xf32, #tpu.memory_space<vmem>>, %arg18: memref<1x1x128xf32, #tpu.memory_space<vmem>>) attributes {dimension_semantics = [#tpu.dimension_semantics<parallel>], iteration_bounds = array<i64: 2>, scalar_prefetch = 0 : i64, scratch_operands = 0 : i64, tpu.core_type = #tpu.core_type<tc>, window_params = [{transform_indices = @transform_0, window_bounds = array<i64: 1, 32, 96>}, {pipeline_mode = #tpu.pipeline_mode<synchronous>, transform_indices = @transform_1, window_bounds = array<i64: 3, 16, 32>}, {pipeline_mode = #tpu.pipeline_mode<synchronous>, transform_indices = @transform_2, window_bounds = array<i64: 3, 96, 256>}, {pipeline_mode = #tpu.pipeline_mode<synchronous>, transform_indices = @transform_3, window_bounds = array<i64: 1, 256>}, {pipeline_mode = #tpu.pipeline_mode<synchronous>, transform_indices = @transform_4, window_bounds = array<i64: 3, 8, 16>}, {pipeline_mode = #tpu.pipeline_mode<synchronous>, transform_indices = @transform_5, window_bounds = array<i64: 3, 256, 256>}, {pipeline_mode = #tpu.pipeline_mode<synchronous>, transform_indices = @transform_6, window_bounds = array<i64: 1, 256>}, {pipeline_mode = #tpu.pipeline_mode<synchronous>, transform_indices = @transform_7, window_bounds = array<i64: 3, 4, 8>}, {pipeline_mode = #tpu.pipeline_mode<synchronous>, transform_indices = @transform_8, window_bounds = array<i64: 3, 256, 256>}, {pipeline_mode = #tpu.pipeline_mode<synchronous>, transform_indices = @transform_9, window_bounds = array<i64: 1, 256>}, {pipeline_mode = #tpu.pipeline_mode<synchronous>, transform_indices = @transform_10, window_bounds = array<i64: 2, 2, 4>}, {pipeline_mode = #tpu.pipeline_mode<synchronous>, transform_indices = @transform_11, window_bounds = array<i64: 2, 256, 128>}, {pipeline_mode = #tpu.pipeline_mode<synchronous>, transform_indices = @transform_12, window_bounds = array<i64: 1, 128>}, {pipeline_mode = #tpu.pipeline_mode<synchronous>, transform_indices = @transform_13, window_bounds = array<i64: 2, 128, 128>}, {pipeline_mode = #tpu.pipeline_mode<synchronous>, transform_indices = @transform_14, window_bounds = array<i64: 1, 128>}, {pipeline_mode = #tpu.pipeline_mode<synchronous>, transform_indices = @transform_15, window_bounds = array<i64: 128, 128>}, {pipeline_mode = #tpu.pipeline_mode<synchronous>, transform_indices = @transform_16, window_bounds = array<i64: 1, 128>}, {transform_indices = @transform_17, window_bounds = array<i64: 1, 1, 128>}]} {
    %c0 = arith.constant 0 : index
    %c0_0 = arith.constant 0 : index
    %c0_1 = arith.constant 0 : index
    %0 = vector.load %arg1[%c0, %c0_0, %c0_1] : memref<1x32x96xf32, #tpu.memory_space<vmem>>, vector<1x32x96xf32>
    %1 = vector.shape_cast %0 : vector<1x32x96xf32> to vector<32x96xf32>
    %2 = arith.truncf %1 : vector<32x96xf32> to vector<32x96xbf16>
    %cst = arith.constant 0.000000e+00 : f32
    %3 = vector.broadcast %cst : f32 to vector<16x256xf32>
    %c0_2 = arith.constant 0 : index
    %c0_3 = arith.constant 0 : index
    %c0_4 = arith.constant 0 : index
    %4 = vector.load %arg2[%c0_2, %c0_3, %c0_4] : memref<3x16x32xbf16, #tpu.memory_space<vmem>>, vector<1x16x32xbf16>
    %5 = vector.shape_cast %4 : vector<1x16x32xbf16> to vector<16x32xbf16>
    %cst_5 = arith.constant dense<0.000000e+00> : vector<16x96xf32>
    %6 = tpu.matmul %5, %2, %cst_5 {dimension_numbers = #tpu.dot_dimension_numbers<[1], [0], [0], [1], [0, 0, 1, 1], [], []>} : vector<16x32xbf16>, vector<32x96xbf16>, vector<16x96xf32> -> vector<16x96xf32>
    %7 = arith.truncf %6 : vector<16x96xf32> to vector<16x96xbf16>
    %c0_6 = arith.constant 0 : index
    %c0_7 = arith.constant 0 : index
    %c0_8 = arith.constant 0 : index
    %8 = vector.load %arg3[%c0_6, %c0_7, %c0_8] : memref<3x96x256xbf16, #tpu.memory_space<vmem>>, vector<1x96x256xbf16>
    %9 = vector.shape_cast %8 : vector<1x96x256xbf16> to vector<96x256xbf16>
    %cst_9 = arith.constant dense<0.000000e+00> : vector<16x256xf32>
    %10 = tpu.matmul %7, %9, %cst_9 {dimension_numbers = #tpu.dot_dimension_numbers<[1], [0], [0], [1], [0, 0, 1, 1], [], []>} : vector<16x96xbf16>, vector<96x256xbf16>, vector<16x256xf32> -> vector<16x256xf32>
    %11 = arith.addf %3, %10 : vector<16x256xf32>
    %c1 = arith.constant 1 : index
    %c0_10 = arith.constant 0 : index
    %c0_11 = arith.constant 0 : index
    %12 = vector.load %arg2[%c1, %c0_10, %c0_11] : memref<3x16x32xbf16, #tpu.memory_space<vmem>>, vector<1x16x32xbf16>
    %13 = vector.shape_cast %12 : vector<1x16x32xbf16> to vector<16x32xbf16>
    %cst_12 = arith.constant dense<0.000000e+00> : vector<16x96xf32>
    %14 = tpu.matmul %13, %2, %cst_12 {dimension_numbers = #tpu.dot_dimension_numbers<[1], [0], [0], [1], [0, 0, 1, 1], [], []>} : vector<16x32xbf16>, vector<32x96xbf16>, vector<16x96xf32> -> vector<16x96xf32>
    %15 = arith.truncf %14 : vector<16x96xf32> to vector<16x96xbf16>
    %c1_13 = arith.constant 1 : index
    %c0_14 = arith.constant 0 : index
    %c0_15 = arith.constant 0 : index
    %16 = vector.load %arg3[%c1_13, %c0_14, %c0_15] : memref<3x96x256xbf16, #tpu.memory_space<vmem>>, vector<1x96x256xbf16>
    %17 = vector.shape_cast %16 : vector<1x96x256xbf16> to vector<96x256xbf16>
    %cst_16 = arith.constant dense<0.000000e+00> : vector<16x256xf32>
    %18 = tpu.matmul %15, %17, %cst_16 {dimension_numbers = #tpu.dot_dimension_numbers<[1], [0], [0], [1], [0, 0, 1, 1], [], []>} : vector<16x96xbf16>, vector<96x256xbf16>, vector<16x256xf32> -> vector<16x256xf32>
    %19 = arith.addf %11, %18 : vector<16x256xf32>
    %c2 = arith.constant 2 : index
    %c0_17 = arith.constant 0 : index
    %c0_18 = arith.constant 0 : index
    %20 = vector.load %arg2[%c2, %c0_17, %c0_18] : memref<3x16x32xbf16, #tpu.memory_space<vmem>>, vector<1x16x32xbf16>
    %21 = vector.shape_cast %20 : vector<1x16x32xbf16> to vector<16x32xbf16>
    %cst_19 = arith.constant dense<0.000000e+00> : vector<16x96xf32>
    %22 = tpu.matmul %21, %2, %cst_19 {dimension_numbers = #tpu.dot_dimension_numbers<[1], [0], [0], [1], [0, 0, 1, 1], [], []>} : vector<16x32xbf16>, vector<32x96xbf16>, vector<16x96xf32> -> vector<16x96xf32>
    %23 = arith.truncf %22 : vector<16x96xf32> to vector<16x96xbf16>
    %c2_20 = arith.constant 2 : index
    %c0_21 = arith.constant 0 : index
    %c0_22 = arith.constant 0 : index
    %24 = vector.load %arg3[%c2_20, %c0_21, %c0_22] : memref<3x96x256xbf16, #tpu.memory_space<vmem>>, vector<1x96x256xbf16>
    %25 = vector.shape_cast %24 : vector<1x96x256xbf16> to vector<96x256xbf16>
    %cst_23 = arith.constant dense<0.000000e+00> : vector<16x256xf32>
    %26 = tpu.matmul %23, %25, %cst_23 {dimension_numbers = #tpu.dot_dimension_numbers<[1], [0], [0], [1], [0, 0, 1, 1], [], []>} : vector<16x96xbf16>, vector<96x256xbf16>, vector<16x256xf32> -> vector<16x256xf32>
    %27 = arith.addf %19, %26 : vector<16x256xf32>
    %c0_24 = arith.constant 0 : index
    %c0_25 = arith.constant 0 : index
    %28 = vector.load %arg4[%c0_24, %c0_25] : memref<1x256xf32, #tpu.memory_space<vmem>>, vector<1x256xf32>
    %29 = vector.broadcast %28 : vector<1x256xf32> to vector<16x256xf32>
    %30 = arith.addf %27, %29 : vector<16x256xf32>
    %cst_26 = arith.constant 0.000000e+00 : f32
    %31 = vector.broadcast %cst_26 : f32 to vector<16x256xf32>
    %32 = arith.maximumf %30, %31 : vector<16x256xf32>
    %33 = arith.truncf %32 : vector<16x256xf32> to vector<16x256xbf16>
    %cst_27 = arith.constant 0.000000e+00 : f32
    %34 = vector.broadcast %cst_27 : f32 to vector<8x256xf32>
    %c0_28 = arith.constant 0 : index
    %c0_29 = arith.constant 0 : index
    %c0_30 = arith.constant 0 : index
    %35 = vector.load %arg5[%c0_28, %c0_29, %c0_30] : memref<3x8x16xbf16, #tpu.memory_space<vmem>>, vector<1x8x16xbf16>
    %36 = vector.shape_cast %35 : vector<1x8x16xbf16> to vector<8x16xbf16>
    %cst_31 = arith.constant dense<0.000000e+00> : vector<8x256xf32>
    %37 = tpu.matmul %36, %33, %cst_31 {dimension_numbers = #tpu.dot_dimension_numbers<[1], [0], [0], [1], [0, 0, 1, 1], [], []>} : vector<8x16xbf16>, vector<16x256xbf16>, vector<8x256xf32> -> vector<8x256xf32>
    %38 = arith.truncf %37 : vector<8x256xf32> to vector<8x256xbf16>
    %c0_32 = arith.constant 0 : index
    %c0_33 = arith.constant 0 : index
    %c0_34 = arith.constant 0 : index
    %39 = vector.load %arg6[%c0_32, %c0_33, %c0_34] : memref<3x256x256xbf16, #tpu.memory_space<vmem>>, vector<1x256x256xbf16>
    %40 = vector.shape_cast %39 : vector<1x256x256xbf16> to vector<256x256xbf16>
    %cst_35 = arith.constant dense<0.000000e+00> : vector<8x256xf32>
    %41 = tpu.matmul %38, %40, %cst_35 {dimension_numbers = #tpu.dot_dimension_numbers<[1], [0], [0], [1], [0, 0, 1, 1], [], []>} : vector<8x256xbf16>, vector<256x256xbf16>, vector<8x256xf32> -> vector<8x256xf32>
    %42 = arith.addf %34, %41 : vector<8x256xf32>
    %c1_36 = arith.constant 1 : index
    %c0_37 = arith.constant 0 : index
    %c0_38 = arith.constant 0 : index
    %43 = vector.load %arg5[%c1_36, %c0_37, %c0_38] : memref<3x8x16xbf16, #tpu.memory_space<vmem>>, vector<1x8x16xbf16>
    %44 = vector.shape_cast %43 : vector<1x8x16xbf16> to vector<8x16xbf16>
    %cst_39 = arith.constant dense<0.000000e+00> : vector<8x256xf32>
    %45 = tpu.matmul %44, %33, %cst_39 {dimension_numbers = #tpu.dot_dimension_numbers<[1], [0], [0], [1], [0, 0, 1, 1], [], []>} : vector<8x16xbf16>, vector<16x256xbf16>, vector<8x256xf32> -> vector<8x256xf32>
    %46 = arith.truncf %45 : vector<8x256xf32> to vector<8x256xbf16>
    %c1_40 = arith.constant 1 : index
    %c0_41 = arith.constant 0 : index
    %c0_42 = arith.constant 0 : index
    %47 = vector.load %arg6[%c1_40, %c0_41, %c0_42] : memref<3x256x256xbf16, #tpu.memory_space<vmem>>, vector<1x256x256xbf16>
    %48 = vector.shape_cast %47 : vector<1x256x256xbf16> to vector<256x256xbf16>
    %cst_43 = arith.constant dense<0.000000e+00> : vector<8x256xf32>
    %49 = tpu.matmul %46, %48, %cst_43 {dimension_numbers = #tpu.dot_dimension_numbers<[1], [0], [0], [1], [0, 0, 1, 1], [], []>} : vector<8x256xbf16>, vector<256x256xbf16>, vector<8x256xf32> -> vector<8x256xf32>
    %50 = arith.addf %42, %49 : vector<8x256xf32>
    %c2_44 = arith.constant 2 : index
    %c0_45 = arith.constant 0 : index
    %c0_46 = arith.constant 0 : index
    %51 = vector.load %arg5[%c2_44, %c0_45, %c0_46] : memref<3x8x16xbf16, #tpu.memory_space<vmem>>, vector<1x8x16xbf16>
    %52 = vector.shape_cast %51 : vector<1x8x16xbf16> to vector<8x16xbf16>
    %cst_47 = arith.constant dense<0.000000e+00> : vector<8x256xf32>
    %53 = tpu.matmul %52, %33, %cst_47 {dimension_numbers = #tpu.dot_dimension_numbers<[1], [0], [0], [1], [0, 0, 1, 1], [], []>} : vector<8x16xbf16>, vector<16x256xbf16>, vector<8x256xf32> -> vector<8x256xf32>
    %54 = arith.truncf %53 : vector<8x256xf32> to vector<8x256xbf16>
    %c2_48 = arith.constant 2 : index
    %c0_49 = arith.constant 0 : index
    %c0_50 = arith.constant 0 : index
    %55 = vector.load %arg6[%c2_48, %c0_49, %c0_50] : memref<3x256x256xbf16, #tpu.memory_space<vmem>>, vector<1x256x256xbf16>
    %56 = vector.shape_cast %55 : vector<1x256x256xbf16> to vector<256x256xbf16>
    %cst_51 = arith.constant dense<0.000000e+00> : vector<8x256xf32>
    %57 = tpu.matmul %54, %56, %cst_51 {dimension_numbers = #tpu.dot_dimension_numbers<[1], [0], [0], [1], [0, 0, 1, 1], [], []>} : vector<8x256xbf16>, vector<256x256xbf16>, vector<8x256xf32> -> vector<8x256xf32>
    %58 = arith.addf %50, %57 : vector<8x256xf32>
    %c0_52 = arith.constant 0 : index
    %c0_53 = arith.constant 0 : index
    %59 = vector.load %arg7[%c0_52, %c0_53] : memref<1x256xf32, #tpu.memory_space<vmem>>, vector<1x256xf32>
    %60 = vector.broadcast %59 : vector<1x256xf32> to vector<8x256xf32>
    %61 = arith.addf %58, %60 : vector<8x256xf32>
    %cst_54 = arith.constant 0.000000e+00 : f32
    %62 = vector.broadcast %cst_54 : f32 to vector<8x256xf32>
    %63 = arith.maximumf %61, %62 : vector<8x256xf32>
    %64 = arith.truncf %63 : vector<8x256xf32> to vector<8x256xbf16>
    %cst_55 = arith.constant 0.000000e+00 : f32
    %65 = vector.broadcast %cst_55 : f32 to vector<4x256xf32>
    %c0_56 = arith.constant 0 : index
    %c0_57 = arith.constant 0 : index
    %c0_58 = arith.constant 0 : index
    %66 = vector.load %arg8[%c0_56, %c0_57, %c0_58] : memref<3x4x8xbf16, #tpu.memory_space<vmem>>, vector<1x4x8xbf16>
    %67 = vector.shape_cast %66 : vector<1x4x8xbf16> to vector<4x8xbf16>
    %cst_59 = arith.constant dense<0.000000e+00> : vector<4x256xf32>
    %68 = tpu.matmul %67, %64, %cst_59 {dimension_numbers = #tpu.dot_dimension_numbers<[1], [0], [0], [1], [0, 0, 1, 1], [], []>} : vector<4x8xbf16>, vector<8x256xbf16>, vector<4x256xf32> -> vector<4x256xf32>
    %69 = arith.truncf %68 : vector<4x256xf32> to vector<4x256xbf16>
    %c0_60 = arith.constant 0 : index
    %c0_61 = arith.constant 0 : index
    %c0_62 = arith.constant 0 : index
    %70 = vector.load %arg9[%c0_60, %c0_61, %c0_62] : memref<3x256x256xbf16, #tpu.memory_space<vmem>>, vector<1x256x256xbf16>
    %71 = vector.shape_cast %70 : vector<1x256x256xbf16> to vector<256x256xbf16>
    %cst_63 = arith.constant dense<0.000000e+00> : vector<4x256xf32>
    %72 = tpu.matmul %69, %71, %cst_63 {dimension_numbers = #tpu.dot_dimension_numbers<[1], [0], [0], [1], [0, 0, 1, 1], [], []>} : vector<4x256xbf16>, vector<256x256xbf16>, vector<4x256xf32> -> vector<4x256xf32>
    %73 = arith.addf %65, %72 : vector<4x256xf32>
    %c1_64 = arith.constant 1 : index
    %c0_65 = arith.constant 0 : index
    %c0_66 = arith.constant 0 : index
    %74 = vector.load %arg8[%c1_64, %c0_65, %c0_66] : memref<3x4x8xbf16, #tpu.memory_space<vmem>>, vector<1x4x8xbf16>
    %75 = vector.shape_cast %74 : vector<1x4x8xbf16> to vector<4x8xbf16>
    %cst_67 = arith.constant dense<0.000000e+00> : vector<4x256xf32>
    %76 = tpu.matmul %75, %64, %cst_67 {dimension_numbers = #tpu.dot_dimension_numbers<[1], [0], [0], [1], [0, 0, 1, 1], [], []>} : vector<4x8xbf16>, vector<8x256xbf16>, vector<4x256xf32> -> vector<4x256xf32>
    %77 = arith.truncf %76 : vector<4x256xf32> to vector<4x256xbf16>
    %c1_68 = arith.constant 1 : index
    %c0_69 = arith.constant 0 : index
    %c0_70 = arith.constant 0 : index
    %78 = vector.load %arg9[%c1_68, %c0_69, %c0_70] : memref<3x256x256xbf16, #tpu.memory_space<vmem>>, vector<1x256x256xbf16>
    %79 = vector.shape_cast %78 : vector<1x256x256xbf16> to vector<256x256xbf16>
    %cst_71 = arith.constant dense<0.000000e+00> : vector<4x256xf32>
    %80 = tpu.matmul %77, %79, %cst_71 {dimension_numbers = #tpu.dot_dimension_numbers<[1], [0], [0], [1], [0, 0, 1, 1], [], []>} : vector<4x256xbf16>, vector<256x256xbf16>, vector<4x256xf32> -> vector<4x256xf32>
    %81 = arith.addf %73, %80 : vector<4x256xf32>
    %c2_72 = arith.constant 2 : index
    %c0_73 = arith.constant 0 : index
    %c0_74 = arith.constant 0 : index
    %82 = vector.load %arg8[%c2_72, %c0_73, %c0_74] : memref<3x4x8xbf16, #tpu.memory_space<vmem>>, vector<1x4x8xbf16>
    %83 = vector.shape_cast %82 : vector<1x4x8xbf16> to vector<4x8xbf16>
    %cst_75 = arith.constant dense<0.000000e+00> : vector<4x256xf32>
    %84 = tpu.matmul %83, %64, %cst_75 {dimension_numbers = #tpu.dot_dimension_numbers<[1], [0], [0], [1], [0, 0, 1, 1], [], []>} : vector<4x8xbf16>, vector<8x256xbf16>, vector<4x256xf32> -> vector<4x256xf32>
    %85 = arith.truncf %84 : vector<4x256xf32> to vector<4x256xbf16>
    %c2_76 = arith.constant 2 : index
    %c0_77 = arith.constant 0 : index
    %c0_78 = arith.constant 0 : index
    %86 = vector.load %arg9[%c2_76, %c0_77, %c0_78] : memref<3x256x256xbf16, #tpu.memory_space<vmem>>, vector<1x256x256xbf16>
    %87 = vector.shape_cast %86 : vector<1x256x256xbf16> to vector<256x256xbf16>
    %cst_79 = arith.constant dense<0.000000e+00> : vector<4x256xf32>
    %88 = tpu.matmul %85, %87, %cst_79 {dimension_numbers = #tpu.dot_dimension_numbers<[1], [0], [0], [1], [0, 0, 1, 1], [], []>} : vector<4x256xbf16>, vector<256x256xbf16>, vector<4x256xf32> -> vector<4x256xf32>
    %89 = arith.addf %81, %88 : vector<4x256xf32>
    %c0_80 = arith.constant 0 : index
    %c0_81 = arith.constant 0 : index
    %90 = vector.load %arg10[%c0_80, %c0_81] : memref<1x256xf32, #tpu.memory_space<vmem>>, vector<1x256xf32>
    %91 = vector.broadcast %90 : vector<1x256xf32> to vector<4x256xf32>
    %92 = arith.addf %89, %91 : vector<4x256xf32>
    %cst_82 = arith.constant 0.000000e+00 : f32
    %93 = vector.broadcast %cst_82 : f32 to vector<4x256xf32>
    %94 = arith.maximumf %92, %93 : vector<4x256xf32>
    %95 = arith.truncf %94 : vector<4x256xf32> to vector<4x256xbf16>
    %cst_83 = arith.constant 0.000000e+00 : f32
    %96 = vector.broadcast %cst_83 : f32 to vector<2x128xf32>
    %c0_84 = arith.constant 0 : index
    %c0_85 = arith.constant 0 : index
    %c0_86 = arith.constant 0 : index
    %97 = vector.load %arg11[%c0_84, %c0_85, %c0_86] : memref<2x2x4xbf16, #tpu.memory_space<vmem>>, vector<1x2x4xbf16>
    %98 = vector.shape_cast %97 : vector<1x2x4xbf16> to vector<2x4xbf16>
    %cst_87 = arith.constant dense<0.000000e+00> : vector<2x256xf32>
    %99 = tpu.matmul %98, %95, %cst_87 {dimension_numbers = #tpu.dot_dimension_numbers<[1], [0], [0], [1], [0, 0, 1, 1], [], []>} : vector<2x4xbf16>, vector<4x256xbf16>, vector<2x256xf32> -> vector<2x256xf32>
    %100 = arith.truncf %99 : vector<2x256xf32> to vector<2x256xbf16>
    %c0_88 = arith.constant 0 : index
    %c0_89 = arith.constant 0 : index
    %c0_90 = arith.constant 0 : index
    %101 = vector.load %arg12[%c0_88, %c0_89, %c0_90] : memref<2x256x128xbf16, #tpu.memory_space<vmem>>, vector<1x256x128xbf16>
    %102 = vector.shape_cast %101 : vector<1x256x128xbf16> to vector<256x128xbf16>
    %cst_91 = arith.constant dense<0.000000e+00> : vector<2x128xf32>
    %103 = tpu.matmul %100, %102, %cst_91 {dimension_numbers = #tpu.dot_dimension_numbers<[1], [0], [0], [1], [0, 0, 1, 1], [], []>} : vector<2x256xbf16>, vector<256x128xbf16>, vector<2x128xf32> -> vector<2x128xf32>
    %104 = arith.addf %96, %103 : vector<2x128xf32>
    %c1_92 = arith.constant 1 : index
    %c0_93 = arith.constant 0 : index
    %c0_94 = arith.constant 0 : index
    %105 = vector.load %arg11[%c1_92, %c0_93, %c0_94] : memref<2x2x4xbf16, #tpu.memory_space<vmem>>, vector<1x2x4xbf16>
    %106 = vector.shape_cast %105 : vector<1x2x4xbf16> to vector<2x4xbf16>
    %cst_95 = arith.constant dense<0.000000e+00> : vector<2x256xf32>
    %107 = tpu.matmul %106, %95, %cst_95 {dimension_numbers = #tpu.dot_dimension_numbers<[1], [0], [0], [1], [0, 0, 1, 1], [], []>} : vector<2x4xbf16>, vector<4x256xbf16>, vector<2x256xf32> -> vector<2x256xf32>
    %108 = arith.truncf %107 : vector<2x256xf32> to vector<2x256xbf16>
    %c1_96 = arith.constant 1 : index
    %c0_97 = arith.constant 0 : index
    %c0_98 = arith.constant 0 : index
    %109 = vector.load %arg12[%c1_96, %c0_97, %c0_98] : memref<2x256x128xbf16, #tpu.memory_space<vmem>>, vector<1x256x128xbf16>
    %110 = vector.shape_cast %109 : vector<1x256x128xbf16> to vector<256x128xbf16>
    %cst_99 = arith.constant dense<0.000000e+00> : vector<2x128xf32>
    %111 = tpu.matmul %108, %110, %cst_99 {dimension_numbers = #tpu.dot_dimension_numbers<[1], [0], [0], [1], [0, 0, 1, 1], [], []>} : vector<2x256xbf16>, vector<256x128xbf16>, vector<2x128xf32> -> vector<2x128xf32>
    %112 = arith.addf %104, %111 : vector<2x128xf32>
    %c0_100 = arith.constant 0 : index
    %c0_101 = arith.constant 0 : index
    %113 = vector.load %arg13[%c0_100, %c0_101] : memref<1x128xf32, #tpu.memory_space<vmem>>, vector<1x128xf32>
    %114 = vector.broadcast %113 : vector<1x128xf32> to vector<2x128xf32>
    %115 = arith.addf %112, %114 : vector<2x128xf32>
    %cst_102 = arith.constant 0.000000e+00 : f32
    %116 = vector.broadcast %cst_102 : f32 to vector<2x128xf32>
    %117 = arith.maximumf %115, %116 : vector<2x128xf32>
    %118 = vector.extract_strided_slice %117 {offsets = [0, 0], sizes = [1, 128], strides = [1, 1]} : vector<2x128xf32> to vector<1x128xf32>
    %119 = arith.truncf %118 : vector<1x128xf32> to vector<1x128xbf16>
    %c0_103 = arith.constant 0 : index
    %c0_104 = arith.constant 0 : index
    %c0_105 = arith.constant 0 : index
    %120 = vector.load %arg14[%c0_103, %c0_104, %c0_105] : memref<2x128x128xbf16, #tpu.memory_space<vmem>>, vector<1x128x128xbf16>
    %121 = vector.shape_cast %120 : vector<1x128x128xbf16> to vector<128x128xbf16>
    %cst_106 = arith.constant dense<0.000000e+00> : vector<1x128xf32>
    %122 = tpu.matmul %119, %121, %cst_106 {dimension_numbers = #tpu.dot_dimension_numbers<[1], [0], [0], [1], [0, 0, 1, 1], [], []>} : vector<1x128xbf16>, vector<128x128xbf16>, vector<1x128xf32> -> vector<1x128xf32>
    %123 = vector.extract_strided_slice %117 {offsets = [1, 0], sizes = [1, 128], strides = [1, 1]} : vector<2x128xf32> to vector<1x128xf32>
    %124 = arith.truncf %123 : vector<1x128xf32> to vector<1x128xbf16>
    %c1_107 = arith.constant 1 : index
    %c0_108 = arith.constant 0 : index
    %c0_109 = arith.constant 0 : index
    %125 = vector.load %arg14[%c1_107, %c0_108, %c0_109] : memref<2x128x128xbf16, #tpu.memory_space<vmem>>, vector<1x128x128xbf16>
    %126 = vector.shape_cast %125 : vector<1x128x128xbf16> to vector<128x128xbf16>
    %cst_110 = arith.constant dense<0.000000e+00> : vector<1x128xf32>
    %127 = tpu.matmul %124, %126, %cst_110 {dimension_numbers = #tpu.dot_dimension_numbers<[1], [0], [0], [1], [0, 0, 1, 1], [], []>} : vector<1x128xbf16>, vector<128x128xbf16>, vector<1x128xf32> -> vector<1x128xf32>
    %128 = arith.addf %122, %127 : vector<1x128xf32>
    %c0_111 = arith.constant 0 : index
    %c0_112 = arith.constant 0 : index
    %129 = vector.load %arg15[%c0_111, %c0_112] : memref<1x128xf32, #tpu.memory_space<vmem>>, vector<1x128xf32>
    %130 = arith.addf %128, %129 : vector<1x128xf32>
    %131 = arith.truncf %130 : vector<1x128xf32> to vector<1x128xbf16>
    %c0_113 = arith.constant 0 : index
    %c0_114 = arith.constant 0 : index
    %132 = vector.load %arg16[%c0_113, %c0_114] : memref<128x128xbf16, #tpu.memory_space<vmem>>, vector<128x128xbf16>
    %cst_115 = arith.constant dense<0.000000e+00> : vector<1x128xf32>
    %133 = tpu.matmul %131, %132, %cst_115 {dimension_numbers = #tpu.dot_dimension_numbers<[1], [0], [0], [1], [0, 0, 1, 1], [], []>} : vector<1x128xbf16>, vector<128x128xbf16>, vector<1x128xf32> -> vector<1x128xf32>
    %c0_116 = arith.constant 0 : index
    %c0_117 = arith.constant 0 : index
    %134 = vector.load %arg17[%c0_116, %c0_117] : memref<1x128xf32, #tpu.memory_space<vmem>>, vector<1x128xf32>
    %135 = arith.addf %133, %134 : vector<1x128xf32>
    %c0_118 = arith.constant 0 : index
    %c0_119 = arith.constant 0 : index
    %c0_120 = arith.constant 0 : index
    %136 = vector.load %arg18[%c0_118, %c0_119, %c0_120] : memref<1x1x128xf32, #tpu.memory_space<vmem>>, vector<1x1x128xf32>
    %137 = vector.shape_cast %136 : vector<1x1x128xf32> to vector<1x128xf32>
    %138 = vector.shape_cast %135 : vector<1x128xf32> to vector<1x1x128xf32>
    tpu.vector_store %arg18[%c0_118, %c0_119, %c0_120], %138 {strides = array<i32>} : memref<1x1x128xf32, #tpu.memory_space<vmem>>, vector<1x1x128xf32>,
    return
  }
  func.func @transform_0(%arg0: i32) -> (i32, i32, i32) {
    %c0_i32 = arith.constant 0 : i32
    %c0_i32_0 = arith.constant 0 : i32
    %c0_i32_1 = arith.constant 0 : i32
    return %arg0, %c0_i32, %c0_i32_0 : i32, i32, i32
  }
  func.func @transform_1(%arg0: i32) -> (i32, i32, i32) {
    %c0_i32 = arith.constant 0 : i32
    %c0_i32_0 = arith.constant 0 : i32
    %c0_i32_1 = arith.constant 0 : i32
    %c0_i32_2 = arith.constant 0 : i32
    return %c0_i32, %c0_i32_0, %c0_i32_1 : i32, i32, i32
  }
  func.func @transform_2(%arg0: i32) -> (i32, i32, i32) {
    %c0_i32 = arith.constant 0 : i32
    %c0_i32_0 = arith.constant 0 : i32
    %c0_i32_1 = arith.constant 0 : i32
    %c0_i32_2 = arith.constant 0 : i32
    return %c0_i32, %c0_i32_0, %c0_i32_1 : i32, i32, i32
  }
  func.func @transform_3(%arg0: i32) -> (i32, i32) {
    %c0_i32 = arith.constant 0 : i32
    %c0_i32_0 = arith.constant 0 : i32
    %c0_i32_1 = arith.constant 0 : i32
    return %c0_i32, %c0_i32_0 : i32, i32
  }
  func.func @transform_4(%arg0: i32) -> (i32, i32, i32) {
    %c0_i32 = arith.constant 0 : i32
    %c0_i32_0 = arith.constant 0 : i32
    %c0_i32_1 = arith.constant 0 : i32
    %c0_i32_2 = arith.constant 0 : i32
    return %c0_i32, %c0_i32_0, %c0_i32_1 : i32, i32, i32
  }
  func.func @transform_5(%arg0: i32) -> (i32, i32, i32) {
    %c0_i32 = arith.constant 0 : i32
    %c0_i32_0 = arith.constant 0 : i32
    %c0_i32_1 = arith.constant 0 : i32
    %c0_i32_2 = arith.constant 0 : i32
    return %c0_i32, %c0_i32_0, %c0_i32_1 : i32, i32, i32
  }
  func.func @transform_6(%arg0: i32) -> (i32, i32) {
    %c0_i32 = arith.constant 0 : i32
    %c0_i32_0 = arith.constant 0 : i32
    %c0_i32_1 = arith.constant 0 : i32
    return %c0_i32, %c0_i32_0 : i32, i32
  }
  func.func @transform_7(%arg0: i32) -> (i32, i32, i32) {
    %c0_i32 = arith.constant 0 : i32
    %c0_i32_0 = arith.constant 0 : i32
    %c0_i32_1 = arith.constant 0 : i32
    %c0_i32_2 = arith.constant 0 : i32
    return %c0_i32, %c0_i32_0, %c0_i32_1 : i32, i32, i32
  }
  func.func @transform_8(%arg0: i32) -> (i32, i32, i32) {
    %c0_i32 = arith.constant 0 : i32
    %c0_i32_0 = arith.constant 0 : i32
    %c0_i32_1 = arith.constant 0 : i32
    %c0_i32_2 = arith.constant 0 : i32
    return %c0_i32, %c0_i32_0, %c0_i32_1 : i32, i32, i32
  }
  func.func @transform_9(%arg0: i32) -> (i32, i32) {
    %c0_i32 = arith.constant 0 : i32
    %c0_i32_0 = arith.constant 0 : i32
    %c0_i32_1 = arith.constant 0 : i32
    return %c0_i32, %c0_i32_0 : i32, i32
  }
  func.func @transform_10(%arg0: i32) -> (i32, i32, i32) {
    %c0_i32 = arith.constant 0 : i32
    %c0_i32_0 = arith.constant 0 : i32
    %c0_i32_1 = arith.constant 0 : i32
    %c0_i32_2 = arith.constant 0 : i32
    return %c0_i32, %c0_i32_0, %c0_i32_1 : i32, i32, i32
  }
  func.func @transform_11(%arg0: i32) -> (i32, i32, i32) {
    %c0_i32 = arith.constant 0 : i32
    %c0_i32_0 = arith.constant 0 : i32
    %c0_i32_1 = arith.constant 0 : i32
    %c0_i32_2 = arith.constant 0 : i32
    return %c0_i32, %c0_i32_0, %c0_i32_1 : i32, i32, i32
  }
  func.func @transform_12(%arg0: i32) -> (i32, i32) {
    %c0_i32 = arith.constant 0 : i32
    %c0_i32_0 = arith.constant 0 : i32
    %c0_i32_1 = arith.constant 0 : i32
    return %c0_i32, %c0_i32_0 : i32, i32
  }
  func.func @transform_13(%arg0: i32) -> (i32, i32, i32) {
    %c0_i32 = arith.constant 0 : i32
    %c0_i32_0 = arith.constant 0 : i32
    %c0_i32_1 = arith.constant 0 : i32
    %c0_i32_2 = arith.constant 0 : i32
    return %c0_i32, %c0_i32_0, %c0_i32_1 : i32, i32, i32
  }
  func.func @transform_14(%arg0: i32) -> (i32, i32) {
    %c0_i32 = arith.constant 0 : i32
    %c0_i32_0 = arith.constant 0 : i32
    %c0_i32_1 = arith.constant 0 : i32
    return %c0_i32, %c0_i32_0 : i32, i32
  }
  func.func @transform_15(%arg0: i32) -> (i32, i32) {
    %c0_i32 = arith.constant 0 : i32
    %c0_i32_0 = arith.constant 0 : i32
    %c0_i32_1 = arith.constant 0 : i32
    return %c0_i32, %c0_i32_0 : i32, i32
  }
  func.func @transform_16(%arg0: i32) -> (i32, i32) {
    %c0_i32 = arith.constant 0 : i32
    %c0_i32_0 = arith.constant 0 : i32
    %c0_i32_1 = arith.constant 0 : i32
    return %c0_i32, %c0_i32_0 : i32, i32
  }
  func.func @transform_17(%arg0: i32) -> (i32, i32, i32) {
    %c0_i32 = arith.constant 0 : i32
    %c0_i32_0 = arith.constant 0 : i32
    %c0_i32_1 = arith.constant 0 : i32
    return %arg0, %c0_i32, %c0_i32_0 : i32, i32, i32
  }
}

</mosaic_0001>

<bundles_post_ra>
// kernel: cnn_layer_4_forward.1
= control target key start
LH: loop header
LB: loop body
LE: loop exit
PB: predicated region body
PF: predicated region fallthrough
CT: control target
= control target key end

     0   :  { %s5997_s0 = inlined_call_operand.vmem [shape: f32[2,32,96], index: 0, kind: input, shape index: {}]   ;;  %s5998_s1 = inlined_call_operand.hbm [shape: bf16[3,16,32], index: 1, kind: input, shape index: {}]   ;;  %s5999_s2 = inlined_call_operand.vmem [shape: bf16[3,96,256], index: 2, kind: input, shape index: {}]   ;;  %s6000_s3 = inlined_call_operand.vmem [shape: f32[1,256], index: 3, kind: input, shape index: {}]   ;;  %s6001_s4 = inlined_call_operand.hbm [shape: bf16[3,8,16], index: 4, kind: input, shape index: {}]   ;;  %s6002_s5 = inlined_call_operand.hbm [shape: bf16[3,256,256], index: 5, kind: input, shape index: {}]   ;;  %s6003_s6 = inlined_call_operand.hbm [shape: f32[1,256], index: 6, kind: input, shape index: {}]   ;;  %s6004_s7 = inlined_call_operand.hbm [shape: bf16[3,4,8], index: 7, kind: input, shape index: {}]   ;;  %s6005_s8 = inlined_call_operand.hbm [shape: bf16[3,256,256], index: 8, kind: input, shape index: {}]   ;;  %s6006_s9 = inlined_call_operand.vmem [shape: f32[1,256], index: 9, kind: input, shape index: {}]   ;;  %s6007_s10 = inlined_call_operand.vmem [shape: bf16[2,2,4], index: 10, kind: input, shape index: {}]   ;;  %s6008_s11 = inlined_call_operand.vmem [shape: bf16[2,256,128], index: 11, kind: input, shape index: {}]   ;;  %s6009_s12 = inlined_call_operand.vmem [shape: f32[1,128], index: 12, kind: input, shape index: {}]   ;;  %s6010_s13 = inlined_call_operand.vmem [shape: bf16[2,128,128], index: 13, kind: input, shape index: {}]   ;;  %s6011_s14 = inlined_call_operand.vmem [shape: f32[1,128], index: 14, kind: input, shape index: {}]   ;;  %s6012_s15 = inlined_call_operand.hbm [shape: bf16[128,128], index: 15, kind: input, shape index: {}]   ;;  %s6013_s16 = inlined_call_operand.vmem [shape: f32[1,128], index: 16, kind: input, shape index: {}]   ;;  %s6014_s17 = inlined_call_operand.hbm [shape: f32[2,1,128], index: 17, kind: output, shape index: {}]  }
   0x1   :  { %6034 = sst [smem:[#allocation27_spill]] %s5997_s0 }
   0x2   :  { %6035 = sst [smem:[#allocation28_spill]] %s5998_s1 }
   0x3   :  { %6036 = sst [smem:[#allocation29_spill]] %s6001_s4 }
   0x4   :  { %6037 = sst [smem:[#allocation30_spill]] %s6002_s5 }
   0x5   :  { %6038 = sst [smem:[#allocation31_spill]] %s6003_s6 }
   0x6   :  { %6039 = sst [smem:[#allocation32_spill]] %s6005_s8 }
   0x7   :  { %6040 = sst [smem:[#allocation33_spill]] %s6011_s14 }
   0x8   :  { %6041 = sst [smem:[#allocation34_spill]] %s6013_s16 }
   0x9   :  { %6042 = sst [smem:[#allocation35_spill]] %s6014_s17 }
   0xa   :  { %22 = vsyncpa [#allocation3], 0 }
   0xb   :  { %23 = vsyncpa [#allocation6], 0 }
   0xc   :  { %24 = vsyncpa [#allocation9], 0 }
   0xd   :  { %25 = vsyncpa [#allocation12], 0 }
   0xe   :  { %26 = vsyncpa [#allocation4], 0 }
   0xf   :  { %28 = vsyncpa [#allocation4 + $0x1], 0  ;;  %s5320_s24 = smov 0   ;;  %s5322_s25 = smov 0  }
  0x10   :  { %s5324_s26 = smov 0   ;;  %s5326_s27 = smov 0  }
  0x11 LB: > { %6043 = sst [smem:[#allocation20_spill]] %s5199_s24  ;;  %s5341_s28 = sadd.s32 4294967295, %s5211_s27   ;;  %s5211_s27 = sphi %s5326_s27, %s6083_s27   ;;  %s5207_s26 = sphi %s5324_s26, %s6085_s26   ;;  %s5203_s25 = sphi %s5322_s25, %s6087_s25   ;;  %s5199_s24 = sphi %s5320_s24, %s6086_s24  }
  0x12   : > { %6044 = sst [smem:[#allocation21_spill]] %s5207_s26  ;;  %s3841_s29 = sadd.s32 4294967294, %s5211_s27  }
  0x13   : > { %6045 = sst [smem:[#allocation22_spill]] %s5211_s27  ;;  %s5345_s0 = sadd.s32 1, %s5211_s27  }
  0x14   : > { %6046 = sst [smem:[#allocation23_spill]] %s5345_s0  ;;  %s403_s30 = sadd.s32 1, %s5207_s26 }
  0x15   : > { %s400_s18 = ssub.s32 %s5211_s27, %s5345_s0  ;;  %p413_p0 = scmp.ne.s32.totalorder %s5207_s26, %s5203_s25 }
  0x16   : > { %p401_p1 = scmp.eq.s32.totalorder %s400_s18, 0  ;;  %p414_p2 = scmp.eq.s32.totalorder %s5341_s28, 1 }
  0x17   : > { %p419_p3 = scmp.ne.s32.totalorder %s5203_s25, %s5199_s24  ;;  %p420_p4 = scmp.eq.s32.totalorder %s3841_s29, 1 }
  0x18   : > { %s5356_s19 = scalar_select %p401_p1, %s5207_s26, %s403_s30  }
  0x19   : > { %p5358_p5 = por %p414_p2, %p413_p0  ;;  %p5362_p6 = por %p420_p4, %p419_p3 }
  0x1a   : > { %6047 = sst [smem:[#allocation24_spill]] %s5356_s19  ;;  %p3842_p7 = scmp.ge.s32.totalorder %s5211_s27, 1 }
  0x1b   : > { %s6048_s1 = scalar_select %p5358_p5, 1, 0 }
  0x1c   : > { %s6050_s20 = scalar_select %p5362_p6, 1, 0 }
  0x1d   : > { %6049 = sst [smem:[#allocation25_spill]] %s6048_s1  ;;  %p427_p8 = scmp.lt.s32.totalorder %s5211_s27, 3 }
  0x1e   : > { %6051 = sst [smem:[#allocation26_spill]] %s6050_s20  ;;  %p6022_p9 = scmp.eq.s32.totalorder %s5341_s28, 0 }
  0x1f   : > { %p5369_p10 = pnand %p3842_p7, %p427_p8  ;;  %s5213_s22 = smov [#allocation5]  }
  0x20   : > { %s458_s23 = sshll.u32 %s5213_s22, 4  ;;  %s5214_s30 = smov [#allocation8]   ;;  %s459_s23 = int_to_ptr.vmem [resolvable:$true] %s458_s23 }
  0x21   : > { %s6052_s21 = scalar_select %p5369_p10, 1, 0 }
  0x22   : > { %p4447_p11 = pneg %p5369_p10  ;;  %s485_s18 = sshll.u32 %s5214_s30, 4  ;;  %s5381_s18 = int_to_ptr.vmem [resolvable:$true] %s485_s18 }
  0x23   : > { %s6054_s4 = sld [smem:[#allocation29_spill]] }
  0x24   : > { %p5377_p12 = pnand %p6022_p9, %p4447_p11 }
  0x26   : > { %p5391_p0 = pneg %p5377_p12 }
  0x29   : > { %s4937_s0 = scalar_lea.hbm %s6054_s4, 192 }
  0x2a   : > { %p4938_p13 = scmp.ne.s32.totalorder %s6054_s4, %s4937_s0  ;;  %p4944_p3 = scmp.lt.u32.totalorder %s4937_s0, %s6054_s4 }
  0x2c   : > { %p4940_p1 = pnand %p5391_p0, %p4938_p13 }
  0x2e   : > { %p4941_p2 = pneg %p4940_p1 }
  0x30   : > { %p4946_p4 = pnand %p4944_p3, %p4941_p2 }
  0x32   : > { %4949 = shalt.err (!%p4946_p4)
}
  0x33   : > { %s4950_s26 = scalar_lea.vmem %s459_s23, 192  ;;  %p4958_p9 = scmp.lt.s32.totalorder %s459_s23, %s459_s23 }
  0x34   : > { %p4951_p7 = scmp.ne.s32.totalorder %s459_s23, %s4950_s26  ;;  %p4959_p6 = scmp.lt.s32.totalorder %s4950_s26, %s4950_s26 }
  0x36   : > { %p4953_p8 = pnand %p4951_p7, %p5391_p0  ;;  %p4960_p5 = por %p4959_p6, %p4958_p9 }
  0x38   : > { %p4954_p11 = pneg %p4953_p8 }
  0x3a   : > { %p4961_p10 = pnand %p4960_p5, %p4954_p11 }
  0x3c   : > { %4964 = shalt.err (!%p4961_p10)
}
  0x3d   : > { %s6028_s24 = smov 64   ;;  %s6030_s19 = smov 4  }
  0x3e   : > { %4453 = dma.hbm_to_vmem [thread:$0]  (!%p5377_p12), %s6054_s4, 192, %s459_s23, [#allocation6], %s6028_s24, %s6028_s24, %s6030_s19  }
  0x3f   : > { %s6056_s6 = sld [smem:[#allocation31_spill]] }
  0x45   : > { %s4965_s17 = scalar_lea.hbm %s6056_s6, 32 }
  0x46   : > { %p4966_p5 = scmp.ne.s32.totalorder %s6056_s6, %s4965_s17  ;;  %p4972_p10 = scmp.lt.u32.totalorder %s4965_s17, %s6056_s6 }
  0x48   : > { %p4968_p6 = pnand %p4966_p5, %p5391_p0 }
  0x4a   : > { %p4969_p9 = pneg %p4968_p6 }
  0x4c   : > { %p4974_p13 = pnand %p4972_p10, %p4969_p9 }
  0x4e   : > { %4977 = shalt.err (!%p4974_p13)
}
  0x4f   : > { %s4978_s23 = scalar_lea.vmem %s5381_s18, 32  ;;  %p4986_p4 = scmp.lt.s32.totalorder %s5381_s18, %s5381_s18 }
  0x50   : > { %p4979_p1 = scmp.ne.s32.totalorder %s5381_s18, %s4978_s23  ;;  %p4987_p7 = scmp.lt.s32.totalorder %s4978_s23, %s4978_s23 }
  0x52   : > { %p4981_p2 = pnand %p4979_p1, %p5391_p0  ;;  %p4988_p8 = por %p4987_p7, %p4986_p4 }
  0x54   : > { %p4982_p3 = pneg %p4981_p2 }
  0x56   : > { %p4989_p11 = pnand %p4988_p8, %p4982_p3 }
  0x58   : > { %4992 = shalt.err (!%p4989_p11)
}
  0x59   : > { %4459 = dma.hbm_to_vmem [thread:$0]  (!%p5377_p12), %s6056_s6, 32, %s5381_s18, [#allocation9]  }
  0x5a   : > { %s5217_s17 = smov [#allocation11]   ;;  %s5218_s27 = smov [#allocation2]  }
  0x5b   : > { %s508_s1 = sshll.u32 %s5217_s17, 4  ;;  %s439_s0 = sshll.u32 %s5218_s27, 4  ;;  %s509_s1 = int_to_ptr.vmem [resolvable:$true] %s508_s1  ;;  %s5433_s0 = int_to_ptr.vmem [resolvable:$true] %s439_s0 }
  0x5c   : > { %s6057_s8 = sld [smem:[#allocation32_spill]] }
  0x62   : > { %s4993_s26 = scalar_lea.hbm %s6057_s8, 12288 }
  0x63   : > { %p4994_p5 = scmp.ne.s32.totalorder %s6057_s8, %s4993_s26  ;;  %p5000_p10 = scmp.lt.u32.totalorder %s4993_s26, %s6057_s8 }
  0x65   : > { %p4996_p6 = pnand %p4994_p5, %p5391_p0 }
  0x67   : > { %p4997_p9 = pneg %p4996_p6 }
  0x69   : > { %p5002_p13 = pnand %p5000_p10, %p4997_p9 }
  0x6b   : > { %5005 = shalt.err (!%p5002_p13)
}
  0x6c   : > { %s5006_s16 = scalar_lea.vmem %s509_s1, 12288  ;;  %p5014_p4 = scmp.lt.s32.totalorder %s509_s1, %s509_s1 }
  0x6d   : > { %p5007_p1 = scmp.ne.s32.totalorder %s509_s1, %s5006_s16  ;;  %p5015_p7 = scmp.lt.s32.totalorder %s5006_s16, %s5006_s16 }
  0x6f   : > { %p5009_p2 = pnand %p5007_p1, %p5391_p0  ;;  %p5016_p8 = por %p5015_p7, %p5014_p4 }
  0x71   : > { %p5010_p3 = pneg %p5009_p2 }
  0x73   : > { %p5017_p11 = pnand %p5016_p8, %p5010_p3 }
  0x75   : > { %5020 = shalt.err (!%p5017_p11)
}
  0x76   : > { %s6032_s24 = smov 128   ;;  %s6033_s17 = smov 8  }
  0x77   : > { %4465 = dma.hbm_to_vmem [thread:$0]  (!%p5377_p12), %s6057_s8, 12288, %s509_s1, [#allocation12], %s6032_s24, %s6032_s24, %s6033_s17  }
  0x78   : > { %s6058_s23 = sld [smem:[#allocation28_spill]] }
  0x7e   : > { %s5021_s14 = scalar_lea.hbm %s6058_s23, 384 }
  0x7f   : > { %p5022_p5 = scmp.ne.s32.totalorder %s6058_s23, %s5021_s14  ;;  %p5028_p10 = scmp.lt.u32.totalorder %s5021_s14, %s6058_s23 }
  0x81   : > { %p5024_p6 = pnand %p5022_p5, %p5391_p0 }
  0x83   : > { %p5025_p9 = pneg %p5024_p6 }
  0x85   : > { %p5030_p13 = pnand %p5028_p10, %p5025_p9 }
  0x87   : > { %5033 = shalt.err (!%p5030_p13)
}
  0x88   : > { %s5034_s1 = scalar_lea.vmem %s5433_s0, 384  ;;  %p5042_p4 = scmp.lt.s32.totalorder %s5433_s0, %s5433_s0 }
  0x89   : > { %p5035_p1 = scmp.ne.s32.totalorder %s5433_s0, %s5034_s1  ;;  %p5043_p7 = scmp.lt.s32.totalorder %s5034_s1, %s5034_s1 }
  0x8b   : > { %p5037_p2 = pnand %p5035_p1, %p5391_p0  ;;  %p5044_p8 = por %p5043_p7, %p5042_p4 }
  0x8d   : > { %p5038_p3 = pneg %p5037_p2 }
  0x8f   : > { %p5045_p11 = pnand %p5044_p8, %p5038_p3 }
  0x91   : > { %5048 = shalt.err (!%p5045_p11)
}
  0x92   : > { %s6059_s4 = smov 4   ;;  %s6060_s19 = smov 64  }
  0x93   : > { %4450 = dma.hbm_to_vmem [thread:$0]  (!%p5377_p12), %s6058_s23, 384, %s5433_s0, [#allocation3], %s6060_s19, %s6060_s19, %s6059_s4  }
  0x94   : > { %s5221_s30 = smov [#allocation7]   ;;  %s5222_s14 = smov [#allocation10]  }
  0x95   : > { %s471_s26 = sshll.u32 %s5221_s30, 4  ;;  %s495_s18 = sshll.u32 %s5222_s14, 4  ;;  %s472_s26 = int_to_ptr.vmem [resolvable:$true] %s471_s26  ;;  %s5482_s18 = int_to_ptr.vmem [resolvable:$true] %s495_s18 }
  0x96   : > { %s6061_s5 = sld [smem:[#allocation30_spill]] }
  0x9c   : > { %s5049_s24 = scalar_lea.hbm %s6061_s5, 12288 }
  0x9d   : > { %p5050_p5 = scmp.ne.s32.totalorder %s6061_s5, %s5049_s24  ;;  %p5056_p10 = scmp.lt.u32.totalorder %s5049_s24, %s6061_s5 }
  0x9f   : > { %p5052_p6 = pnand %p5050_p5, %p5391_p0 }
  0xa1   : > { %p5053_p9 = pneg %p5052_p6 }
  0xa3   : > { %p5058_p13 = pnand %p5056_p10, %p5053_p9 }
  0xa5   : > { %5061 = shalt.err (!%p5058_p13)
}
  0xa6   : > { %s5062_s20 = scalar_lea.vmem %s472_s26, 12288  ;;  %p5070_p4 = scmp.lt.s32.totalorder %s472_s26, %s472_s26 }
  0xa7   : > { %p5063_p1 = scmp.ne.s32.totalorder %s472_s26, %s5062_s20  ;;  %p5071_p7 = scmp.lt.s32.totalorder %s5062_s20, %s5062_s20 }
  0xa9   : > { %p5065_p2 = pnand %p5063_p1, %p5391_p0  ;;  %p5072_p8 = por %p5071_p7, %p5070_p4 }
  0xab   : > { %p5066_p3 = pneg %p5065_p2 }
  0xad   : > { %p5073_p11 = pnand %p5072_p8, %p5066_p3 }
  0xaf   : > { %5076 = shalt.err (!%p5073_p11)
}
  0xb0   : > { %s6062_s6 = smov 8   ;;  %s6063_s17 = smov 128  }
  0xb1   : > { %4456 = dma.hbm_to_vmem [thread:$0]  (!%p5377_p12), %s6061_s5, 12288, %s472_s26, [#allocation6], %s6063_s17, %s6063_s17, %s6062_s6  }
  0xb2   : > { %s5077_s1 = scalar_lea.hbm %s6004_s7, 96 }
  0xb3   : > { %p5078_p5 = scmp.ne.s32.totalorder %s6004_s7, %s5077_s1  ;;  %p5084_p10 = scmp.lt.u32.totalorder %s5077_s1, %s6004_s7 }
  0xb5   : > { %p5080_p6 = pnand %p5078_p5, %p5391_p0 }
  0xb7   : > { %p5081_p9 = pneg %p5080_p6 }
  0xb9   : > { %p5086_p13 = pnand %p5084_p10, %p5081_p9 }
  0xbb   : > { %5089 = shalt.err (!%p5086_p13)
}
  0xbc   : > { %s5090_s26 = scalar_lea.vmem %s5482_s18, 96  ;;  %p5098_p4 = scmp.lt.s32.totalorder %s5482_s18, %s5482_s18 }
  0xbd   : > { %p5091_p1 = scmp.ne.s32.totalorder %s5482_s18, %s5090_s26  ;;  %p5099_p7 = scmp.lt.s32.totalorder %s5090_s26, %s5090_s26 }
  0xbf   : > { %p5093_p2 = pnand %p5091_p1, %p5391_p0  ;;  %p5100_p8 = por %p5099_p7, %p5098_p4 }
  0xc1   : > { %p5094_p3 = pneg %p5093_p2 }
  0xc3   : > { %p5101_p11 = pnand %p5100_p8, %p5094_p3 }
  0xc5   : > { %5104 = shalt.err (!%p5101_p11)
}
  0xc6   : > { %s5223_s6 = smov 32   ;;  %s5224_s8 = smov 2  }
  0xc7   : > { %4462 = dma.hbm_to_vmem [thread:$0]  (!%p5377_p12), %s6004_s7, 96, %s5482_s18, [#allocation9], %s5223_s6, %s5223_s6, %s5224_s8  }
  0xc8   : > { %s5225_s24 = smov [#allocation13]   ;;  %s5105_s27 = scalar_lea.hbm %s6012_s15, 1024 }
  0xc9   : > { %s539_s14 = sshll.u32 %s5225_s24, 4  ;;  %p5106_p5 = scmp.ne.s32.totalorder %s6012_s15, %s5105_s27  ;;  %s540_s14 = int_to_ptr.vmem [resolvable:$true] %s539_s14 }
  0xca   : > { %p5112_p10 = scmp.lt.u32.totalorder %s5105_s27, %s6012_s15 }
  0xcb   : > { %p5108_p6 = pnand %p5106_p5, %p5391_p0 }
  0xcd   : > { %p5109_p9 = pneg %p5108_p6 }
  0xcf   : > { %p5114_p13 = pnand %p5112_p10, %p5109_p9 }
  0xd1   : > { %5117 = shalt.err (!%p5114_p13)
}
  0xd2   : > { %s5118_s18 = scalar_lea.vmem %s540_s14, 1024  ;;  %p5126_p4 = scmp.lt.s32.totalorder %s540_s14, %s540_s14 }
  0xd3   : > { %p5119_p1 = scmp.ne.s32.totalorder %s540_s14, %s5118_s18  ;;  %p5127_p7 = scmp.lt.s32.totalorder %s5118_s18, %s5118_s18 }
  0xd5   : > { %p5121_p2 = pnand %p5119_p1, %p5391_p0  ;;  %p5128_p8 = por %p5127_p7, %p5126_p4 }
  0xd7   : > { %p5122_p3 = pneg %p5121_p2 }
  0xd9   : > { %p5129_p11 = pnand %p5128_p8, %p5122_p3 }
  0xdb   : > { %5132 = shalt.err (!%p5129_p11)
}
  0xdc   : > { %4468 = dma.hbm_to_vmem [thread:$0]  (!%p5377_p12), %s6012_s15, 1024, %s540_s14, [#allocation12], %s6060_s19, %s6060_s19, %s6059_s4  }
  0xdd   : > { %p6064_p5 = scmp.ne.s32.totalorder %s6052_s21, 0 }
  0xde   : > { %p6065_p0 = scmp.eq.s32.totalorder (!%p6064_p5), %s5341_s28, 0 }
  0xdf   : > { %566 = sbr.rel (%p6064_p5) target bundleno = 3027 (0xbd3), region = 88 }
  0xe6   : > { %5178 = dma.done.wait (%p6065_p0), [#allocation3], 384   ;;  %p6066_p6 = pmov %p6065_p0 }
  0xe7   : > { %p6067_p9 = pmov %p6065_p0 }
  0xe8   : > { %5180 = vsyncadd (%p6066_p6), [#allocation3], 4294966912 }
  0xe9   : > { %5182 = dma.done.wait (%p6067_p9), [#allocation6], 12480   ;;  %p6068_p10 = pmov %p6065_p0 }
  0xea   : > { %p6069_p13 = pmov %p6065_p0 }
  0xeb   : > { %5184 = vsyncadd (%p6068_p10), [#allocation6], 4294954816 }
  0xec   : > { %5186 = dma.done.wait (%p6069_p13), [#allocation9], 128   ;;  %p6070_p12 = pmov %p6065_p0 }
  0xed   : > { %p6071_p1 = pmov %p6065_p0 }
  0xee   : > { %5188 = vsyncadd (%p6070_p12), [#allocation9], 4294967168 }
  0xef   : > { %5190 = dma.done.wait (%p6071_p1), [#allocation12], 13312   ;;  %p6072_p2 = pmov %p6065_p0 }
  0xf0   : > { %p641_p3 = scmp.lt.s32.totalorder %s5341_s28, 1  ;;  %v5226_v0 = vmov 0.0   ;;  %vm5227_vm0 = vmmov 0   ;;  %s6073_s19 = sld [smem:[#allocation27_spill]]  ;;  %v4539_v7 = vld [vmem:[%s5999_s2 + $0x64] ss:$8 sps:$4 sm:$0xff]  }
  0xf1   : > { %5192 = vsyncadd (%p6072_p2), [#allocation12], 4294953984  ;;  %4325 = vmatprep.subr.bf16.mxu1 %v5226_v0  ;;  %4329 = vmatprep.mubr.msk.bf16.mxu1 %vm5227_vm0, %v5226_v0  ;;  %v4541_v8 = vld [vmem:[%s5999_s2 + $0x60] ss:$8 sps:$4 sm:$0xff]   ;;  %v4542_v10 = vld [vmem:[%s5999_s2 + $0x74] ss:$8 sps:$4 sm:$0xff]  }
  0xf2   : > { %s642_s21 = scalar_select %p641_p3, %s5341_s28, 1  ;;  %v4536_v9 = vld [vmem:[#allocation2] sm:$0xff]   ;;  %vm660_vm1 = vcmask 261120   ;;  %848 = vmatprep.subr.bf16.mxu0 %v4539_v7  ;;  %v4544_v11 = vld [vmem:[%s5999_s2 + $0x70] ss:$8 sps:$4 sm:$0xff]   ;;  %v4537_v14 = vld [vmem:[#allocation2 + $0x8] sm:$0xff]  }
  0xf3   : > { %849 = vmatpush1.bf16.msra.mxu0 %v4541_v8  ;;  %v4545_v12 = vld [vmem:[%s5999_s2 + $0x84] ss:$8 sps:$4 sm:$0xff]   ;;  %v4547_v13 = vld [vmem:[%s5999_s2 + $0x80] ss:$8 sps:$4 sm:$0xff]   ;;  %v4538_v15 = vld [vmem:[#allocation2 + $0x10] sm:$0xff]   ;;  %v5228_v23 = vmov 0  }
  0xf4   : > { %s4244_s29 = sshll.u32 %s642_s21, 5  ;;  %850 = vmatprep.subr.bf16.mxu0 %v4542_v10  ;;  %v4548_v16 = vld [vmem:[%s5999_s2 + $0x94] ss:$8 sps:$4 sm:$0xff]   ;;  %v4550_v17 = vld [vmem:[%s5999_s2 + $0x90] ss:$8 sps:$4 sm:$0xff]   ;;  %880 = vmatprep.mubr.bf16.mxu0 %v5228_v23  ;;  %vm844_vm2 = vcmask 785408  }
  0xf5   : > { %v4551_v18 = vld [vmem:[%s5999_s2 + $0xa4] ss:$8 sps:$4 sm:$0xff]   ;;  %v4553_v19 = vld [vmem:[%s5999_s2 + $0xa0] ss:$8 sps:$4 sm:$0xff]   ;;  %v4554_v20 = vld [vmem:[%s5999_s2 + $0xb4] ss:$8 sps:$4 sm:$0xff]  }
  0xf6   : > { %s645_s8 = scalar_lea.vmem %s6073_s19, %s4244_s29  ;;  %v4556_v21 = vld [vmem:[%s5999_s2 + $0xb0] ss:$8 sps:$4 sm:$0xff]   ;;  %v4559_v22 = vld [vmem:[%s5999_s2 + $0x4] ss:$8 sps:$4 sm:$0xff]   ;;  %v4557_v32 = vld [vmem:[%s5999_s2] ss:$8 sps:$4 sm:$0xff]  }
  0xf7   : > { %v647_v1 = vld [vmem:[%s645_s8] sm:$0xff]  ;;  %v648_v2 = vld [vmem:[%s645_s8 + $0x8] sm:$0xff]  ;;  %v649_v3 = vld [vmem:[%s645_s8 + $0x10] sm:$0xff]  ;;  %851 = vmatpush1.bf16.msra.mxu0 %v4544_v11  ;;  %vm1196_vm3 = vcmask 130048   ;;  %vm2065_vm4 = vcmask 1043456   ;;  %vm2061_vm5 = vcmask 64512  }
  0xf8   : > { %v651_v4 = vpack.c.bf16 %v648_v2, %v647_v1  ;;  %v650_v5 = vld [vmem:[%s645_s8 + $0x18] sm:$0xff]  ;;  %852 = vmatprep.subr.bf16.mxu0 %v4545_v12  ;;  %v4565_v37 = vld [vmem:[%s5999_s2 + $0x24] ss:$8 sps:$4 sm:$0xff]   ;;  %v4563_v40 = vld [vmem:[%s5999_s2 + $0x20] ss:$8 sps:$4 sm:$0xff]   ;;  %vm2937_vm6 = vcmask 1041408  }
  0xf9   : > { %v652_v6 = vpack.c.bf16 %v650_v5, %v649_v3  ;;  %v4562_v35 = vld [vmem:[%s5999_s2 + $0x14] ss:$8 sps:$4 sm:$0xff]   ;;  %v4560_v36 = vld [vmem:[%s5999_s2 + $0x10] ss:$8 sps:$4 sm:$0xff]   ;;  %v4571_v46 = vld [vmem:[%s5999_s2 + $0x44] ss:$8 sps:$4 sm:$0xff]  }
  0xfa   : > { %4326 = vmatpush3.bf16.msra.mxu1 %v651_v4  ;;  %v4568_v42 = vld [vmem:[%s5999_s2 + $0x34] ss:$8 sps:$4 sm:$0xff]   ;;  %v4566_v45 = vld [vmem:[%s5999_s2 + $0x30] ss:$8 sps:$4 sm:$0xff]   ;;  %v4569_v47 = vld [vmem:[%s5999_s2 + $0x40] ss:$8 sps:$4 sm:$0xff]  }
  0xfb   : > { %4327 = vmatprep.subr.bf16.mxu1 %v5226_v0  ;;  %853 = vmatpush1.bf16.msra.mxu0 %v4547_v13  ;;  %v4574_v48 = vld [vmem:[%s5999_s2 + $0x54] ss:$8 sps:$4 sm:$0xff]   ;;  %v4572_v49 = vld [vmem:[%s5999_s2 + $0x50] ss:$8 sps:$4 sm:$0xff]   ;;  %v4577_v50 = vld [vmem:[%s5999_s2 + $0xc4] ss:$8 sps:$4 sm:$0xff]  }
  0xfc   : > { %854 = vmatprep.subr.bf16.mxu0 %v4548_v16  ;;  %v4575_v51 = vld [vmem:[%s5999_s2 + $0xc0] ss:$8 sps:$4 sm:$0xff]   ;;  %v4580_v52 = vld [vmem:[%s5999_s2 + $0xd4] ss:$8 sps:$4 sm:$0xff]   ;;  %v4578_v53 = vld [vmem:[%s5999_s2 + $0xd0] ss:$8 sps:$4 sm:$0xff]   ;;  %v1175_v16 = vlaneseq }
  0xfd   : > { %v4583_v54 = vld [vmem:[%s5999_s2 + $0xe4] ss:$8 sps:$4 sm:$0xff]   ;;  %v4581_v55 = vld [vmem:[%s5999_s2 + $0xe0] ss:$8 sps:$4 sm:$0xff]   ;;  %v4586_v56 = vld [vmem:[%s5999_s2 + $0xf4] ss:$8 sps:$4 sm:$0xff]  }
  0xfe   : > { %4328 = vmatpush3.bf16.msra.mxu1 %v652_v6  ;;  %v4584_v57 = vld [vmem:[%s5999_s2 + $0xf0] ss:$8 sps:$4 sm:$0xff]   ;;  %v4589_v58 = vld [vmem:[%s5999_s2 + $0x104] ss:$8 sps:$4 sm:$0xff]   ;;  %v4587_v59 = vld [vmem:[%s5999_s2 + $0x100] ss:$8 sps:$4 sm:$0xff]  }
  0xff   : > { %4333 = vmatprep.subr.bf16.mxu1 %v5226_v0  ;;  %855 = vmatpush1.bf16.msra.mxu0 %v4550_v17  ;;  %v4592_v60 = vld [vmem:[%s5999_s2 + $0x114] ss:$8 sps:$4 sm:$0xff]   ;;  %v4590_v61 = vld [vmem:[%s5999_s2 + $0x110] ss:$8 sps:$4 sm:$0xff]   ;;  %v4641_v62 = vld [vmem:[#allocation7] ss:$8 sps:$4 sm:$0xff]  }
 0x100   : > { %856 = vmatprep.subr.bf16.mxu0 %v4551_v18  ;;  %v4643_v63 = vld [vmem:[#allocation7 + $0x4] ss:$8 sps:$4 sm:$0xff]   ;;  %v4646_v1 = vld [vmem:[#allocation7 + $0x14] ss:$8 sps:$4 sm:$0xff]   ;;  %v4644_v2 = vld [vmem:[#allocation7 + $0x10] ss:$8 sps:$4 sm:$0xff]  }
 0x101   : > { %4330 = vmatmul.mubr.msk.bf16.vlgmr.msra.gmra.mrb[0].mxu1 %vm660_vm1, %v4536_v9  ;;  %v4649_v3 = vld [vmem:[#allocation7 + $0x24] ss:$8 sps:$4 sm:$0xff]   ;;  %v4652_v5 = vld [vmem:[#allocation7 + $0x34] ss:$8 sps:$4 sm:$0xff]   ;;  %v4653_v8 = vld [vmem:[#allocation7 + $0x40] ss:$8 sps:$4 sm:$0xff]  }
 0x102   : > { %4334 = vmatpush3.bf16.msra.mxu1 %v651_v4  ;;  %4337 = vmatprep.mubr.msk.bf16.mxu1 %vm5227_vm0, %v5226_v0  ;;  %v4655_v7 = vld [vmem:[#allocation7 + $0x44] ss:$8 sps:$4 sm:$0xff]   ;;  %v4658_v9 = vld [vmem:[#allocation7 + $0x54] ss:$8 sps:$4 sm:$0xff]   ;;  %v4656_v10 = vld [vmem:[#allocation7 + $0x50] ss:$8 sps:$4 sm:$0xff]  }
 0x103   : > { %4335 = vmatprep.subr.bf16.mxu1 %v5226_v0  ;;  %857 = vmatpush1.bf16.msra.mxu0 %v4553_v19  ;;  %v4661_v11 = vld [vmem:[#allocation7 + $0x64] ss:$8 sps:$4 sm:$0xff]   ;;  %v4659_v12 = vld [vmem:[#allocation7 + $0x60] ss:$8 sps:$4 sm:$0xff]   ;;  %v4664_v13 = vld [vmem:[#allocation7 + $0x74] ss:$8 sps:$4 sm:$0xff]  }
 0x104   : > { %858 = vmatprep.subr.bf16.mxu0 %v4554_v20  ;;  %v4665_v17 = vld [vmem:[#allocation7 + $0x80] ss:$8 sps:$4 sm:$0xff]   ;;  %v4670_v18 = vld [vmem:[#allocation7 + $0x94] ss:$8 sps:$4 sm:$0xff]   ;;  %v1176_v19 = vshrl.u32 %v1175_v16, 7  ;;  %vm2933_vm7 = vcmask 31744  }
 0x105   : > { %v4668_v20 = vld [vmem:[#allocation7 + $0x90] ss:$8 sps:$4 sm:$0xff]   ;;  %v4634_v16 = vld [vmem:[#allocation7 + $0x1d4] ss:$8 sps:$4 sm:$0xff]   ;;  %s6074_s26 = sld [smem:[#allocation33_spill]]  ;;  %s639_s18 = sand.u32 1, %s5203_s25  }
 0x106   : > { %4336 = vmatpush3.bf16.msra.mxu1 %v652_v6  ;;  %s6075_s21 = sld [smem:[#allocation34_spill]]  ;;  %s6076_s29 = sld [smem:[#allocation25_spill]] }
 0x107   : > { %4341 = vmatprep.subr.bf16.mxu1 %v5226_v0  ;;  %859 = vmatpush1.bf16.msra.mxu0 %v4556_v21  ;;  %v4673_v21 = vld [vmem:[#allocation7 + $0xa4] ss:$8 sps:$4 sm:$0xff]   ;;  %s4241_s22 = sshll.u32 %s5341_s28, 4  ;;  %s640_s4 = scalar_lea.vmem [#allocation14], %s639_s18 }
 0x108   : > { %954 = vmatprep.subr.bf16.mxu0 %v4559_v22  ;;  %v5702_v22 = vsub.s32 0, %v1176_v19  ;;  %s3717_s19 = sshll.u32 %s640_s4, 4  ;;  %s6077_s30 = sld [smem:[#allocation35_spill]]  ;;  %s5957_s19 = int_to_ptr.vmem [resolvable:$true] %s3717_s19 }
 0x109   : > { %4338 = vmatmul.mubr.msk.bf16.vlgmr.msra.gmra.mrb[4].mxu1 %vm660_vm1, %v4537_v14  ;;  %v4662_v14 = vld [vmem:[#allocation7 + $0x70] ss:$8 sps:$4 sm:$0xff]   ;;  %s3705_s14 = scalar_lea.sflag [#allocation4], %s639_s18  ;;  %s5133_s28 = scalar_lea.vmem %s5957_s19, 16 }
 0x10a   : > { %4342 = vmatpush3.bf16.msra.mxu1 %v651_v4  ;;  %4345 = vmatprep.mubr.msk.bf16.mxu1 %vm5227_vm0, %v5226_v0  ;;  %v4647_v4 = vld [vmem:[#allocation7 + $0x20] ss:$8 sps:$4 sm:$0xff]   ;;  %p5134_p4 = scmp.ne.s32.totalorder %s5957_s19, %s5133_s28  ;;  %s5229_s16 = smov [#allocation14]  }
 0x10b   : > { %4343 = vmatprep.subr.bf16.mxu1 %v5226_v0  ;;  %s5137_s1 = sshll.u32 %s5229_s16, 4  ;;  %s5138_s1 = int_to_ptr.vmem [resolvable:$false] %s5137_s1 }
 0x10c   : > { %p6078_p7 = scmp.ne.s32.totalorder %s6076_s29, 0  ;;  %s5139_s27 = scalar_lea.vmem %s5138_s1, 32 }
 0x10d   : > { %p5140_p5 = scmp.lt.s32.totalorder %s5957_s19, %s5138_s1  ;;  %p5141_p0 = scmp.lt.s32.totalorder %s5139_s27, %s5133_s28 }
 0x10e   : > { %4344 = vmatpush3.bf16.msra.mxu1 %v652_v6  ;;  %v4650_v6 = vld [vmem:[#allocation7 + $0x30] ss:$8 sps:$4 sm:$0xff]   ;;  %s5955_s24 = scalar_lea.hbm %s6077_s30, %s4241_s22  ;;  %p5135_p8 = pnand %p5134_p4, %p6078_p7 }
 0x10f   : > { %p5142_p6 = por %p5141_p0, %p5140_p5 }
 0x110   : > { %p5136_p11 = pneg %p5135_p8 }
 0x111   : > { %4346 = vmatmul.mubr.msk.bf16.vlgmr.msra.gmra.mrb[8].mxu1 %vm660_vm1, %v4538_v15  ;;  %v4667_v15 = vld [vmem:[#allocation7 + $0x84] ss:$8 sps:$4 sm:$0xff]  }
 0x112   : > { %1232 = vmatprep.mubr.bf16.mxu1 %v5228_v23  ;;  %p5143_p9 = pnand %p5142_p6, %p5136_p11 }
 0x1d4   : > { %v698_v24 = vpop.f32.mrb[0].mxu1 }
 0x1d5   : > { %v4331_v25 = vpop.f32.mrb[1].mxu1 }
 0x1d6   : > { %v701_v26 = vpop.f32.mrb[2].mxu1  ;;  %v5707_v25 = vsub.s32 1, %v1176_v19  ;;  %v4635_v19 = vld [vmem:[#allocation7 + $0x1e0] ss:$8 sps:$4 sm:$0xff]  }
 0x1d7   : > { %v705_v27 = vpack.c.bf16 %v701_v26, %v698_v24  ;;  %v4332_v28 = vpop.f32.mrb[3].mxu1  ;;  %v1173_v24 = vld [vmem:[%s6000_s3] sm:$0x3]  ;;  %v4671_v26 = vld [vmem:[#allocation7 + $0xa0] ss:$8 sps:$4 sm:$0xff]  }
 0x1d8   : > { %v1178_v28 = vrot.slane %v1173_v24, %v5702_v22 }
 0x1dc   : > { %v763_v29 = vpop.f32.mrb[4].mxu1 }
 0x1dd   : > { %v4339_v30 = vpop.f32.mrb[5].mxu1 }
 0x1de   : > { %v766_v31 = vpop.f32.mrb[6].mxu1  ;;  %v4674_v30 = vld [vmem:[#allocation7 + $0xb0] ss:$8 sps:$4 sm:$0xff]  }
 0x1df   : > { %v770_v33 = vpack.c.bf16 %v766_v31, %v763_v29  ;;  %v4340_v34 = vpop.f32.mrb[7].mxu1  ;;  %v1182_v29 = vrot.slane %v1173_v24, %v5707_v25  ;;  %v4688_v24 = vld [vmem:[#allocation7 + $0xf4] ss:$8 sps:$4 sm:$0xff]  }
 0x1e1   : > { %3889 = vmatmul.mubr.msk.bf16.vlgmr.msra.gmra.mrb[0].mxu0 %vm844_vm2, %v770_v33 }
 0x1e2   : > { %955 = vmatpush1.bf16.msra.mxu0 %v4557_v32  ;;  %986 = vmatprep.mubr.bf16.mxu0 %v5228_v23  ;;  %v4679_v32 = vld [vmem:[#allocation7 + $0xc4] ss:$8 sps:$4 sm:$0xff]  }
 0x1e3   : > { %956 = vmatprep.subr.bf16.mxu0 %v4562_v35 }
 0x1e4   : > { %v1042_v38 = vpop.f32.mrb[8].mxu1 }
 0x1e5   : > { %v4347_v39 = vpop.f32.mrb[9].mxu1 }
 0x1e6   : > { %957 = vmatpush1.bf16.msra.mxu0 %v4560_v36  ;;  %v1045_v41 = vpop.f32.mrb[10].mxu1  ;;  %v4677_v39 = vld [vmem:[#allocation7 + $0xc0] ss:$8 sps:$4 sm:$0xff]  }
 0x1e7   : > { %958 = vmatprep.subr.bf16.mxu0 %v4565_v37  ;;  %v1049_v43 = vpack.c.bf16 %v1045_v41, %v1042_v38  ;;  %v4348_v44 = vpop.f32.mrb[11].mxu1  ;;  %v4682_v41 = vld [vmem:[#allocation7 + $0xd4] ss:$8 sps:$4 sm:$0xff]  }
 0x1ea   : > { %959 = vmatpush1.bf16.msra.mxu0 %v4563_v40 }
 0x1eb   : > { %960 = vmatprep.subr.bf16.mxu0 %v4568_v42 }
 0x1ee   : > { %961 = vmatpush1.bf16.msra.mxu0 %v4566_v45 }
 0x1ef   : > { %962 = vmatprep.subr.bf16.mxu0 %v4571_v46 }
 0x1f2   : > { %963 = vmatpush1.bf16.msra.mxu0 %v4569_v47  ;;  %v4680_v47 = vld [vmem:[#allocation7 + $0xd0] ss:$8 sps:$4 sm:$0xff]  }
 0x1f3   : > { %964 = vmatprep.subr.bf16.mxu0 %v4574_v48 }
 0x1f6   : > { %965 = vmatpush1.bf16.msra.mxu0 %v4572_v49  ;;  %v4685_v49 = vld [vmem:[#allocation7 + $0xe4] ss:$8 sps:$4 sm:$0xff]  }
 0x1f7   : > { %1126 = vmatprep.subr.bf16.mxu0 %v4577_v50  ;;  %v1195_v50 = vld [vmem:[#allocation5] sm:$0xf] }
 0x1f9   : > { %3902 = vmatmul.mubr.msk.bf16.vlgmr.msra.gmra.mrb[0].mxu0 %vm844_vm2, %v705_v27  ;;  %v4676_v27 = vld [vmem:[#allocation7 + $0xb4] ss:$8 sps:$4 sm:$0xff]  }
 0x1fa   : > { %1127 = vmatpush1.bf16.msra.mxu0 %v4575_v51  ;;  %1158 = vmatprep.mubr.bf16.mxu0 %v5228_v23  ;;  %v4595_v51 = vld [vmem:[#allocation7 + $0x104] ss:$8 sps:$4 sm:$0xff]  }
 0x1fb   : > { %1128 = vmatprep.subr.bf16.mxu0 %v4580_v52  ;;  %v4683_v52 = vld [vmem:[#allocation7 + $0xe0] ss:$8 sps:$4 sm:$0xff]  }
 0x1fe   : > { %1129 = vmatpush1.bf16.msra.mxu0 %v4578_v53  ;;  %v4593_v53 = vld [vmem:[#allocation7 + $0x100] ss:$8 sps:$4 sm:$0xff]  }
 0x1ff   : > { %1130 = vmatprep.subr.bf16.mxu0 %v4583_v54  ;;  %v1276_v54 = vld [vmem:[#allocation5 + $0x4] sm:$0xf] }
 0x202   : > { %1131 = vmatpush1.bf16.msra.mxu0 %v4581_v55  ;;  %v4598_v55 = vld [vmem:[#allocation7 + $0x114] ss:$8 sps:$4 sm:$0xff]  }
 0x203   : > { %1132 = vmatprep.subr.bf16.mxu0 %v4586_v56  ;;  %v4596_v56 = vld [vmem:[#allocation7 + $0x110] ss:$8 sps:$4 sm:$0xff]  }
 0x206   : > { %1133 = vmatpush1.bf16.msra.mxu0 %v4584_v57  ;;  %v4601_v57 = vld [vmem:[#allocation7 + $0x124] ss:$8 sps:$4 sm:$0xff]  }
 0x207   : > { %1134 = vmatprep.subr.bf16.mxu0 %v4589_v58  ;;  %v4599_v58 = vld [vmem:[#allocation7 + $0x120] ss:$8 sps:$4 sm:$0xff]  }
 0x20a   : > { %1135 = vmatpush1.bf16.msra.mxu0 %v4587_v59  ;;  %v4604_v59 = vld [vmem:[#allocation7 + $0x134] ss:$8 sps:$4 sm:$0xff]  }
 0x20b   : > { %1136 = vmatprep.subr.bf16.mxu0 %v4592_v60  ;;  %v4602_v60 = vld [vmem:[#allocation7 + $0x130] ss:$8 sps:$4 sm:$0xff]  }
 0x20e   : > { %1137 = vmatpush1.bf16.msra.mxu0 %v4590_v61  ;;  %v4607_v61 = vld [vmem:[#allocation7 + $0x144] ss:$8 sps:$4 sm:$0xff]  }
 0x20f   : > { %1717 = vmatprep.subr.bf16.mxu0 %v4643_v63  ;;  %v4610_v63 = vld [vmem:[#allocation7 + $0x154] ss:$8 sps:$4 sm:$0xff]  }
 0x211   : > { %3929 = vmatmul.mubr.msk.bf16.vlgmr.msra.gmra.mrb[0].mxu0 %vm844_vm2, %v1049_v43 }
 0x212   : > { %1718 = vmatpush1.bf16.msra.mxu0 %v4641_v62  ;;  %v4605_v62 = vld [vmem:[#allocation7 + $0x140] ss:$8 sps:$4 sm:$0xff]  }
 0x213   : > { %1719 = vmatprep.subr.bf16.mxu0 %v4646_v1  ;;  %v4608_v1 = vld [vmem:[#allocation7 + $0x150] ss:$8 sps:$4 sm:$0xff]  }
 0x216   : > { %1720 = vmatpush1.bf16.msra.mxu0 %v4644_v2  ;;  %v4613_v2 = vld [vmem:[#allocation7 + $0x164] ss:$8 sps:$4 sm:$0xff]  }
 0x217   : > { %1721 = vmatprep.subr.bf16.mxu0 %v4649_v3  ;;  %v4611_v3 = vld [vmem:[#allocation7 + $0x160] ss:$8 sps:$4 sm:$0xff]  }
 0x21a   : > { %1722 = vmatpush1.bf16.msra.mxu0 %v4647_v4  ;;  %v4616_v4 = vld [vmem:[#allocation7 + $0x174] ss:$8 sps:$4 sm:$0xff]  }
 0x21b   : > { %1723 = vmatprep.subr.bf16.mxu0 %v4652_v5  ;;  %v4614_v5 = vld [vmem:[#allocation7 + $0x170] ss:$8 sps:$4 sm:$0xff]  }
 0x21e   : > { %1724 = vmatpush1.bf16.msra.mxu0 %v4650_v6  ;;  %v4619_v6 = vld [vmem:[#allocation7 + $0x184] ss:$8 sps:$4 sm:$0xff]  }
 0x21f   : > { %1725 = vmatprep.subr.bf16.mxu0 %v4655_v7  ;;  %v4617_v7 = vld [vmem:[#allocation7 + $0x180] ss:$8 sps:$4 sm:$0xff]  }
 0x222   : > { %1726 = vmatpush1.bf16.msra.mxu0 %v4653_v8  ;;  %v4622_v8 = vld [vmem:[#allocation7 + $0x194] ss:$8 sps:$4 sm:$0xff]  }
 0x223   : > { %1727 = vmatprep.subr.bf16.mxu0 %v4658_v9  ;;  %v4620_v9 = vld [vmem:[#allocation7 + $0x190] ss:$8 sps:$4 sm:$0xff]  }
 0x226   : > { %1728 = vmatpush1.bf16.msra.mxu0 %v4656_v10  ;;  %v4625_v10 = vld [vmem:[#allocation7 + $0x1a4] ss:$8 sps:$4 sm:$0xff]  }
 0x227   : > { %1729 = vmatprep.subr.bf16.mxu0 %v4661_v11  ;;  %v4623_v11 = vld [vmem:[#allocation7 + $0x1a0] ss:$8 sps:$4 sm:$0xff]  }
 0x22a   : > { %1730 = vmatpush1.bf16.msra.mxu0 %v4659_v12  ;;  %v4628_v12 = vld [vmem:[#allocation7 + $0x1b4] ss:$8 sps:$4 sm:$0xff]  }
 0x22b   : > { %1731 = vmatprep.subr.bf16.mxu0 %v4664_v13  ;;  %v4626_v13 = vld [vmem:[#allocation7 + $0x1b0] ss:$8 sps:$4 sm:$0xff]  }
 0x22e   : > { %1732 = vmatpush1.bf16.msra.mxu0 %v4662_v14  ;;  %v4631_v14 = vld [vmem:[#allocation7 + $0x1c4] ss:$8 sps:$4 sm:$0xff]  }
 0x22f   : > { %1733 = vmatprep.subr.bf16.mxu0 %v4667_v15  ;;  %v4629_v15 = vld [vmem:[#allocation7 + $0x1c0] ss:$8 sps:$4 sm:$0xff]  }
 0x232   : > { %1734 = vmatpush1.bf16.msra.mxu0 %v4665_v17  ;;  %v4632_v17 = vld [vmem:[#allocation7 + $0x1d0] ss:$8 sps:$4 sm:$0xff]  }
 0x233   : > { %1735 = vmatprep.subr.bf16.mxu0 %v4670_v18  ;;  %v4637_v18 = vld [vmem:[#allocation7 + $0x1e4] ss:$8 sps:$4 sm:$0xff]  }
 0x236   : > { %1736 = vmatpush1.bf16.msra.mxu0 %v4668_v20  ;;  %v4640_v20 = vld [vmem:[#allocation7 + $0x1f4] ss:$8 sps:$4 sm:$0xff]  }
 0x237   : > { %1737 = vmatprep.subr.bf16.mxu0 %v4673_v21  ;;  %v4638_v21 = vld [vmem:[#allocation7 + $0x1f0] ss:$8 sps:$4 sm:$0xff]  }
 0x23a   : > { %1738 = vmatpush1.bf16.msra.mxu0 %v4671_v26  ;;  %v4686_v26 = vld [vmem:[#allocation7 + $0xf0] ss:$8 sps:$4 sm:$0xff]  }
 0x23b   : > { %1739 = vmatprep.subr.bf16.mxu0 %v4676_v27 }
 0x23e   : > { %1740 = vmatpush1.bf16.msra.mxu0 %v4674_v30 }
 0x23f   : > { %1741 = vmatprep.subr.bf16.mxu0 %v4679_v32 }
 0x242   : > { %1742 = vmatpush1.bf16.msra.mxu0 %v4677_v39  ;;  %v4691_v39 = vld [vmem:[#allocation7 + $0x204] ss:$8 sps:$4 sm:$0xff]  }
 0x243   : > { %1743 = vmatprep.subr.bf16.mxu0 %v4682_v41  ;;  %v4689_v41 = vld [vmem:[#allocation7 + $0x200] ss:$8 sps:$4 sm:$0xff]  }
 0x246   : > { %1744 = vmatpush1.bf16.msra.mxu0 %v4680_v47  ;;  %v4700_v47 = vld [vmem:[#allocation7 + $0x234] ss:$8 sps:$4 sm:$0xff]  }
 0x247   : > { %1745 = vmatprep.subr.bf16.mxu0 %v4685_v49  ;;  %v4701_v49 = vld [vmem:[#allocation7 + $0x240] ss:$8 sps:$4 sm:$0xff]  }
 0x24a   : > { %1746 = vmatpush1.bf16.msra.mxu0 %v4683_v52  ;;  %v4709_v52 = vld [vmem:[#allocation7 + $0x264] ss:$8 sps:$4 sm:$0xff]  }
 0x24b   : > { %1747 = vmatprep.subr.bf16.mxu0 %v4688_v24 }
 0x24e   : > { %1748 = vmatpush1.bf16.msra.mxu0 %v4686_v26 }
 0x2e4   : > { %v1160_v31 = vpop.f32.mrb[0].mxu0 }
 0x2e5   : > { %v1185_v33 = vadd.f32 %v1178_v28, %v1160_v31  ;;  %v1162_v34 = vpop.f32.mrb[1].mxu0 }
 0x2e6   : > { %v1186_v35 = vadd.f32 %v1182_v29, %v1162_v34  ;;  %v1164_v36 = vpop.f32.mrb[2].mxu0 }
 0x2e7   : > { %v1187_v37 = vadd.f32 %v1178_v28, %v1164_v36  ;;  %v1166_v38 = vpop.f32.mrb[3].mxu0  ;;  %v1189_v42 = vmax.f32 %v1185_v33, 0.0 }
 0x2e8   : > { %v1188_v40 = vadd.f32 %v1182_v29, %v1166_v38  ;;  %v1190_v44 = vmax.f32 %v1186_v35, 0.0 }
 0x2e9   : > { %v1191_v43 = vmax.f32 %v1187_v37, 0.0 }
 0x2ea   : > { %v1192_v45 = vmax.f32 %v1188_v40, 0.0  ;;  %v1759_v40 = vld [vmem:[#allocation5 + $0x8] sm:$0xf] }
 0x2eb   : > { %v5711_v46 = vpack.c.bf16 %v1191_v43, %v1189_v42  ;;  %v4694_v42 = vld [vmem:[#allocation7 + $0x214] ss:$8 sps:$4 sm:$0xff]   ;;  %v4692_v43 = vld [vmem:[#allocation7 + $0x210] ss:$8 sps:$4 sm:$0xff]  }
 0x2ec   : > { %v5713_v48 = vpack.c.bf16 %v1192_v45, %v1190_v44  ;;  %v4697_v44 = vld [vmem:[#allocation7 + $0x224] ss:$8 sps:$4 sm:$0xff]   ;;  %v4695_v45 = vld [vmem:[#allocation7 + $0x220] ss:$8 sps:$4 sm:$0xff]  }
 0x2ee   : > { %1200 = vmatprep.subr.bf16.mxu1 %v5713_v48 }
 0x2ef   : > { %1201 = vmatpush1.bf16.msra.mxu1 %v5711_v46 }
 0x2f0   : > { %1280 = vmatprep.subr.bf16.mxu1 %v5713_v48 }
 0x2f2   : > { %3930 = vmatmul.mubr.msk.bf16.vlgmr.msra.gmra.mrb[12].mxu1 %vm1196_vm3, %v1195_v50  ;;  %v4706_v50 = vld [vmem:[#allocation7 + $0x254] ss:$8 sps:$4 sm:$0xff]  }
 0x2f3   : > { %1281 = vmatpush1.bf16.msra.mxu1 %v5711_v46  ;;  %1312 = vmatprep.mubr.bf16.mxu1 %v5228_v23 }
 0x2f4   : > { %1516 = vmatprep.subr.bf16.mxu1 %v4595_v51  ;;  %v4704_v51 = vld [vmem:[#allocation7 + $0x250] ss:$8 sps:$4 sm:$0xff]  }
 0x2fa   : > { %3931 = vmatmul.mubr.msk.bf16.vlgmr.msra.gmra.mrb[16].mxu1 %vm1196_vm3, %v1276_v54  ;;  %v4712_v54 = vld [vmem:[#allocation7 + $0x274] ss:$8 sps:$4 sm:$0xff]  }
 0x2fb   : > { %1517 = vmatpush1.bf16.msra.mxu1 %v4593_v53  ;;  %v4707_v53 = vld [vmem:[#allocation7 + $0x260] ss:$8 sps:$4 sm:$0xff]  }
 0x2fc   : > { %1518 = vmatprep.subr.bf16.mxu1 %v4598_v55  ;;  %v4710_v55 = vld [vmem:[#allocation7 + $0x270] ss:$8 sps:$4 sm:$0xff]  }
 0x2ff   : > { %1519 = vmatpush1.bf16.msra.mxu1 %v4596_v56  ;;  %v4715_v56 = vld [vmem:[#allocation7 + $0x284] ss:$8 sps:$4 sm:$0xff]  }
 0x300   : > { %1520 = vmatprep.subr.bf16.mxu1 %v4601_v57  ;;  %v4713_v57 = vld [vmem:[#allocation7 + $0x280] ss:$8 sps:$4 sm:$0xff]  }
 0x303   : > { %1521 = vmatpush1.bf16.msra.mxu1 %v4599_v58  ;;  %v4718_v58 = vld [vmem:[#allocation7 + $0x294] ss:$8 sps:$4 sm:$0xff]  }
 0x304   : > { %1522 = vmatprep.subr.bf16.mxu1 %v4604_v59  ;;  %v4716_v59 = vld [vmem:[#allocation7 + $0x290] ss:$8 sps:$4 sm:$0xff]  }
 0x307   : > { %1523 = vmatpush1.bf16.msra.mxu1 %v4602_v60  ;;  %v4721_v60 = vld [vmem:[#allocation7 + $0x2a4] ss:$8 sps:$4 sm:$0xff]  }
 0x308   : > { %1524 = vmatprep.subr.bf16.mxu1 %v4607_v61  ;;  %v4719_v61 = vld [vmem:[#allocation7 + $0x2a0] ss:$8 sps:$4 sm:$0xff]  }
 0x30b   : > { %1525 = vmatpush1.bf16.msra.mxu1 %v4605_v62  ;;  %v4724_v62 = vld [vmem:[#allocation7 + $0x2b4] ss:$8 sps:$4 sm:$0xff]  }
 0x30c   : > { %1526 = vmatprep.subr.bf16.mxu1 %v4610_v63  ;;  %v4722_v63 = vld [vmem:[#allocation7 + $0x2b0] ss:$8 sps:$4 sm:$0xff]  }
 0x30f   : > { %1527 = vmatpush1.bf16.msra.mxu1 %v4608_v1  ;;  %v4725_v1 = vld [vmem:[#allocation7 + $0x2c0] ss:$8 sps:$4 sm:$0xff]  }
 0x310   : > { %1528 = vmatprep.subr.bf16.mxu1 %v4613_v2  ;;  %v4727_v2 = vld [vmem:[#allocation7 + $0x2c4] ss:$8 sps:$4 sm:$0xff]  }
 0x313   : > { %1529 = vmatpush1.bf16.msra.mxu1 %v4611_v3  ;;  %v4730_v3 = vld [vmem:[#allocation7 + $0x2d4] ss:$8 sps:$4 sm:$0xff]  }
 0x314   : > { %1530 = vmatprep.subr.bf16.mxu1 %v4616_v4  ;;  %v4728_v4 = vld [vmem:[#allocation7 + $0x2d0] ss:$8 sps:$4 sm:$0xff]  }
 0x317   : > { %1531 = vmatpush1.bf16.msra.mxu1 %v4614_v5  ;;  %v4731_v5 = vld [vmem:[#allocation7 + $0x2e0] ss:$8 sps:$4 sm:$0xff]  }
 0x318   : > { %1532 = vmatprep.subr.bf16.mxu1 %v4619_v6  ;;  %v4733_v6 = vld [vmem:[#allocation7 + $0x2e4] ss:$8 sps:$4 sm:$0xff]  }
 0x31b   : > { %1533 = vmatpush1.bf16.msra.mxu1 %v4617_v7  ;;  %v4736_v7 = vld [vmem:[#allocation7 + $0x2f4] ss:$8 sps:$4 sm:$0xff]  }
 0x31c   : > { %1534 = vmatprep.subr.bf16.mxu1 %v4622_v8  ;;  %v4734_v8 = vld [vmem:[#allocation7 + $0x2f0] ss:$8 sps:$4 sm:$0xff]  }
 0x31f   : > { %1535 = vmatpush1.bf16.msra.mxu1 %v4620_v9 }
 0x320   : > { %1536 = vmatprep.subr.bf16.mxu1 %v4625_v10 }
 0x323   : > { %1537 = vmatpush1.bf16.msra.mxu1 %v4623_v11 }
 0x324   : > { %1538 = vmatprep.subr.bf16.mxu1 %v4628_v12 }
 0x327   : > { %1539 = vmatpush1.bf16.msra.mxu1 %v4626_v13 }
 0x328   : > { %1540 = vmatprep.subr.bf16.mxu1 %v4631_v14 }
 0x32b   : > { %1541 = vmatpush1.bf16.msra.mxu1 %v4629_v15 }
 0x32c   : > { %1542 = vmatprep.subr.bf16.mxu1 %v4634_v16 }
 0x32f   : > { %1543 = vmatpush1.bf16.msra.mxu1 %v4632_v17 }
 0x330   : > { %1544 = vmatprep.subr.bf16.mxu1 %v4637_v18 }
 0x333   : > { %1545 = vmatpush1.bf16.msra.mxu1 %v4635_v19 }
 0x334   : > { %1546 = vmatprep.subr.bf16.mxu1 %v4640_v20 }
 0x337   : > { %1547 = vmatpush1.bf16.msra.mxu1 %v4638_v21 }
 0x338   : > { %1763 = vmatprep.subr.bf16.mxu1 %v5713_v48  ;;  %v4698_v48 = vld [vmem:[#allocation7 + $0x230] ss:$8 sps:$4 sm:$0xff]  }
 0x3c5   : > { %v1234_v27 = vpop.f32.mrb[12].mxu1 }
 0x3c6   : > { %v1236_v28 = vpop.f32.mrb[13].mxu1  ;;  %v1241_v31 = vpack.c.bf16 %v1234_v27, %v1234_v27 }
 0x3c7   : > { %v1242_v29 = vpack.c.bf16 %v1236_v28, %v1236_v28  ;;  %v1238_v30 = vpop.f32.mrb[14].mxu1  ;;  %v4785_v28 = vld [vmem:[#allocation11] ss:$8 sps:$4 sm:$0xff]  }
 0x3c8   : > { %v1239_v32 = vpop.f32.mrb[15].mxu1  ;;  %v4790_v30 = vld [vmem:[#allocation11 + $0x14] ss:$8 sps:$4 sm:$0xff]  }
 0x3c9   : > { %1749 = vmatprep.mubr.bf16.mxu0 %v1242_v29  ;;  %v4787_v29 = vld [vmem:[#allocation11 + $0x4] ss:$8 sps:$4 sm:$0xff]  }
 0x3ca   : > { %1750 = vmatmul.mubr.bf16.vlgmr.msra.gmra.mrb[4].mxu0 %v1241_v31  ;;  %v4788_v31 = vld [vmem:[#allocation11 + $0x10] ss:$8 sps:$4 sm:$0xff]   ;;  %v4793_v32 = vld [vmem:[#allocation11 + $0x24] ss:$8 sps:$4 sm:$0xff]  }
 0x3cb   : > { %2104 = vmatprep.mubr.bf16.mxu0 %v5228_v23 }
 0x3cd   : > { %v1314_v33 = vpop.f32.mrb[16].mxu1 }
 0x3ce   : > { %v1316_v34 = vpop.f32.mrb[17].mxu1  ;;  %v1321_v37 = vpack.c.bf16 %v1314_v33, %v1314_v33  ;;  %v4791_v33 = vld [vmem:[#allocation11 + $0x20] ss:$8 sps:$4 sm:$0xff]  }
 0x3cf   : > { %v1322_v35 = vpack.c.bf16 %v1316_v34, %v1316_v34  ;;  %v1318_v36 = vpop.f32.mrb[18].mxu1  ;;  %v4796_v34 = vld [vmem:[#allocation11 + $0x34] ss:$8 sps:$4 sm:$0xff]  }
 0x3d0   : > { %v1319_v38 = vpop.f32.mrb[19].mxu1  ;;  %v4799_v36 = vld [vmem:[#allocation11 + $0x44] ss:$8 sps:$4 sm:$0xff]  }
 0x3d1   : > { %1548 = vmatprep.mubr.bf16.mxu1 %v1322_v35  ;;  %v4794_v35 = vld [vmem:[#allocation11 + $0x30] ss:$8 sps:$4 sm:$0xff]   ;;  %v4802_v38 = vld [vmem:[#allocation11 + $0x54] ss:$8 sps:$4 sm:$0xff]  }
 0x3d2   : > { %1549 = vmatmul.mubr.bf16.vlgmr.msra.gmra.mrb[20].mxu1 %v1321_v37  ;;  %v4797_v37 = vld [vmem:[#allocation11 + $0x40] ss:$8 sps:$4 sm:$0xff]  }
 0x3d3   : > { %1764 = vmatpush1.bf16.msra.mxu1 %v5711_v46  ;;  %1795 = vmatprep.mubr.bf16.mxu1 %v5228_v23  ;;  %v4703_v46 = vld [vmem:[#allocation7 + $0x244] ss:$8 sps:$4 sm:$0xff]  }
 0x3d4   : > { %1999 = vmatprep.subr.bf16.mxu1 %v4691_v39  ;;  %v4800_v39 = vld [vmem:[#allocation11 + $0x50] ss:$8 sps:$4 sm:$0xff]  }
 0x3da   : > { %3996 = vmatmul.mubr.msk.bf16.vlgmr.msra.gmra.mrb[24].mxu1 %vm1196_vm3, %v1759_v40  ;;  %v4805_v40 = vld [vmem:[#allocation11 + $0x64] ss:$8 sps:$4 sm:$0xff]  }
 0x3db   : > { %2000 = vmatpush1.bf16.msra.mxu1 %v4689_v41  ;;  %v4803_v41 = vld [vmem:[#allocation11 + $0x60] ss:$8 sps:$4 sm:$0xff]  }
 0x3dc   : > { %2001 = vmatprep.subr.bf16.mxu1 %v4694_v42  ;;  %v4808_v42 = vld [vmem:[#allocation11 + $0x74] ss:$8 sps:$4 sm:$0xff]  }
 0x3df   : > { %2002 = vmatpush1.bf16.msra.mxu1 %v4692_v43  ;;  %v4806_v43 = vld [vmem:[#allocation11 + $0x70] ss:$8 sps:$4 sm:$0xff]  }
 0x3e0   : > { %2003 = vmatprep.subr.bf16.mxu1 %v4697_v44  ;;  %v4811_v44 = vld [vmem:[#allocation11 + $0x84] ss:$8 sps:$4 sm:$0xff]  }
 0x3e3   : > { %2004 = vmatpush1.bf16.msra.mxu1 %v4695_v45  ;;  %v4809_v45 = vld [vmem:[#allocation11 + $0x80] ss:$8 sps:$4 sm:$0xff]  }
 0x3e4   : > { %2005 = vmatprep.subr.bf16.mxu1 %v4700_v47  ;;  %v4814_v47 = vld [vmem:[#allocation11 + $0x94] ss:$8 sps:$4 sm:$0xff]  }
 0x3e7   : > { %2006 = vmatpush1.bf16.msra.mxu1 %v4698_v48  ;;  %v4812_v48 = vld [vmem:[#allocation11 + $0x90] ss:$8 sps:$4 sm:$0xff]  }
 0x3e8   : > { %2007 = vmatprep.subr.bf16.mxu1 %v4703_v46  ;;  %v4817_v46 = vld [vmem:[#allocation11 + $0xa4] ss:$8 sps:$4 sm:$0xff]  }
 0x3eb   : > { %2008 = vmatpush1.bf16.msra.mxu1 %v4701_v49  ;;  %v4815_v49 = vld [vmem:[#allocation11 + $0xa0] ss:$8 sps:$4 sm:$0xff]  }
 0x3ec   : > { %2009 = vmatprep.subr.bf16.mxu1 %v4706_v50  ;;  %v2042_v50 = vld [vmem:[#allocation8] sm:$0x3] }
 0x3ef   : > { %2010 = vmatpush1.bf16.msra.mxu1 %v4704_v51  ;;  %v4820_v51 = vld [vmem:[#allocation11 + $0xb4] ss:$8 sps:$4 sm:$0xff]  }
 0x3f0   : > { %2011 = vmatprep.subr.bf16.mxu1 %v4709_v52  ;;  %v2047_v52 = vrot.slane %v2042_v50, %v5702_v22 }
 0x3f3   : > { %2012 = vmatpush1.bf16.msra.mxu1 %v4707_v53  ;;  %v4818_v53 = vld [vmem:[#allocation11 + $0xb0] ss:$8 sps:$4 sm:$0xff]  }
 0x3f4   : > { %2013 = vmatprep.subr.bf16.mxu1 %v4712_v54 }
 0x3f7   : > { %2014 = vmatpush1.bf16.msra.mxu1 %v4710_v55  ;;  %v2051_v55 = vrot.slane %v2042_v50, %v5707_v25 }
 0x3f8   : > { %2015 = vmatprep.subr.bf16.mxu1 %v4715_v56  ;;  %v4823_v56 = vld [vmem:[#allocation11 + $0xc4] ss:$8 sps:$4 sm:$0xff]  }
 0x3fb   : > { %2016 = vmatpush1.bf16.msra.mxu1 %v4713_v57 }
 0x3fc   : > { %2017 = vmatprep.subr.bf16.mxu1 %v4718_v58 }
 0x3ff   : > { %2018 = vmatpush1.bf16.msra.mxu1 %v4716_v59 }
 0x400   : > { %2019 = vmatprep.subr.bf16.mxu1 %v4721_v60 }
 0x403   : > { %2020 = vmatpush1.bf16.msra.mxu1 %v4719_v61 }
 0x404   : > { %2021 = vmatprep.subr.bf16.mxu1 %v4724_v62 }
 0x407   : > { %2022 = vmatpush1.bf16.msra.mxu1 %v4722_v63  ;;  %v4821_v63 = vld [vmem:[#allocation11 + $0xc0] ss:$8 sps:$4 sm:$0xff]  }
 0x408   : > { %2023 = vmatprep.subr.bf16.mxu1 %v4727_v2  ;;  %v4826_v2 = vld [vmem:[#allocation11 + $0xd4] ss:$8 sps:$4 sm:$0xff]  }
 0x40b   : > { %2024 = vmatpush1.bf16.msra.mxu1 %v4725_v1 }
 0x40c   : > { %2025 = vmatprep.subr.bf16.mxu1 %v4730_v3 }
 0x40f   : > { %2026 = vmatpush1.bf16.msra.mxu1 %v4728_v4 }
 0x410   : > { %2027 = vmatprep.subr.bf16.mxu1 %v4733_v6  ;;  %v4824_v6 = vld [vmem:[#allocation11 + $0xd0] ss:$8 sps:$4 sm:$0xff]  }
 0x413   : > { %2028 = vmatpush1.bf16.msra.mxu1 %v4731_v5 }
 0x414   : > { %2029 = vmatprep.subr.bf16.mxu1 %v4736_v7 }
 0x417   : > { %2030 = vmatpush1.bf16.msra.mxu1 %v4734_v8  ;;  %v4829_v8 = vld [vmem:[#allocation11 + $0xe4] ss:$8 sps:$4 sm:$0xff]  }
 0x418   : > { %2589 = vmatprep.subr.bf16.mxu1 %v4787_v29  ;;  %v4755_v29 = vld [vmem:[#allocation11 + $0x160] ss:$8 sps:$4 sm:$0xff]  }
 0x49d   : > { %v1751_v9 = vpop.f32.mrb[4].mxu0 }
 0x49e   : > { %v1753_v10 = vpop.f32.mrb[5].mxu0 }
 0x49f   : > { %v1755_v11 = vpop.f32.mrb[6].mxu0 }
 0x4a0   : > { %v1756_v12 = vpop.f32.mrb[7].mxu0  ;;  %v4739_v11 = vld [vmem:[#allocation11 + $0x104] ss:$8 sps:$4 sm:$0xff]  }
 0x4a1   : > { %v4827_v12 = vld [vmem:[#allocation11 + $0xe0] ss:$8 sps:$4 sm:$0xff]  }
 0x4a5   : > { %v1550_v13 = vpop.f32.mrb[20].mxu1 }
 0x4a6   : > { %v5727_v14 = vadd.f32 %v1751_v9, %v1550_v13  ;;  %v1552_v15 = vpop.f32.mrb[21].mxu1  ;;  %v4737_v13 = vld [vmem:[#allocation11 + $0x100] ss:$8 sps:$4 sm:$0xff]  }
 0x4a7   : > { %v5729_v16 = vadd.f32 %v1753_v10, %v1552_v15  ;;  %v1554_v17 = vpop.f32.mrb[22].mxu1  ;;  %v2060_v10 = vld [vmem:[#allocation10] sm:$0x3]  ;;  %v4742_v15 = vld [vmem:[#allocation11 + $0x114] ss:$8 sps:$4 sm:$0xff]  }
 0x4a8   : > { %v1555_v18 = vpop.f32.mrb[23].mxu1  ;;  %v4745_v17 = vld [vmem:[#allocation11 + $0x124] ss:$8 sps:$4 sm:$0xff]  }
 0x4a9   : > { %v4743_v18 = vld [vmem:[#allocation11 + $0x120] ss:$8 sps:$4 sm:$0xff]  }
 0x4ad   : > { %v1797_v19 = vpop.f32.mrb[24].mxu1 }
 0x4ae   : > { %v1799_v20 = vpop.f32.mrb[25].mxu1  ;;  %v1804_v26 = vpack.c.bf16 %v1797_v19, %v1797_v19  ;;  %v4748_v19 = vld [vmem:[#allocation11 + $0x134] ss:$8 sps:$4 sm:$0xff]  }
 0x4af   : > { %v1805_v21 = vpack.c.bf16 %v1799_v20, %v1799_v20  ;;  %v1801_v24 = vpop.f32.mrb[26].mxu1  ;;  %v4746_v20 = vld [vmem:[#allocation11 + $0x130] ss:$8 sps:$4 sm:$0xff]  }
 0x4b0   : > { %v1802_v27 = vpop.f32.mrb[27].mxu1  ;;  %v4749_v24 = vld [vmem:[#allocation11 + $0x140] ss:$8 sps:$4 sm:$0xff]  }
 0x4b1   : > { %2031 = vmatprep.mubr.bf16.mxu1 %v1805_v21  ;;  %v4751_v21 = vld [vmem:[#allocation11 + $0x144] ss:$8 sps:$4 sm:$0xff]   ;;  %v4752_v27 = vld [vmem:[#allocation11 + $0x150] ss:$8 sps:$4 sm:$0xff]  }
 0x4b2   : > { %2032 = vmatmul.mubr.bf16.vlgmr.msra.gmra.mrb[28].mxu1 %v1804_v26  ;;  %v4754_v26 = vld [vmem:[#allocation11 + $0x154] ss:$8 sps:$4 sm:$0xff]  }
 0x4b3   : > { %2590 = vmatpush1.bf16.msra.mxu1 %v4785_v28  ;;  %v4757_v28 = vld [vmem:[#allocation11 + $0x164] ss:$8 sps:$4 sm:$0xff]  }
 0x4b4   : > { %2591 = vmatprep.subr.bf16.mxu1 %v4790_v30  ;;  %v4760_v30 = vld [vmem:[#allocation11 + $0x174] ss:$8 sps:$4 sm:$0xff]  }
 0x4b7   : > { %2592 = vmatpush1.bf16.msra.mxu1 %v4788_v31  ;;  %v4758_v31 = vld [vmem:[#allocation11 + $0x170] ss:$8 sps:$4 sm:$0xff]  }
 0x4b8   : > { %2593 = vmatprep.subr.bf16.mxu1 %v4793_v32  ;;  %v4763_v32 = vld [vmem:[#allocation11 + $0x184] ss:$8 sps:$4 sm:$0xff]  }
 0x4bb   : > { %2594 = vmatpush1.bf16.msra.mxu1 %v4791_v33  ;;  %v4761_v33 = vld [vmem:[#allocation11 + $0x180] ss:$8 sps:$4 sm:$0xff]  }
 0x4bc   : > { %2595 = vmatprep.subr.bf16.mxu1 %v4796_v34  ;;  %v4766_v34 = vld [vmem:[#allocation11 + $0x194] ss:$8 sps:$4 sm:$0xff]  }
 0x4bf   : > { %2596 = vmatpush1.bf16.msra.mxu1 %v4794_v35  ;;  %v4764_v35 = vld [vmem:[#allocation11 + $0x190] ss:$8 sps:$4 sm:$0xff]  }
 0x4c0   : > { %2597 = vmatprep.subr.bf16.mxu1 %v4799_v36  ;;  %v4769_v36 = vld [vmem:[#allocation11 + $0x1a4] ss:$8 sps:$4 sm:$0xff]  }
 0x4c3   : > { %2598 = vmatpush1.bf16.msra.mxu1 %v4797_v37  ;;  %v4767_v37 = vld [vmem:[#allocation11 + $0x1a0] ss:$8 sps:$4 sm:$0xff]  }
 0x4c4   : > { %2599 = vmatprep.subr.bf16.mxu1 %v4802_v38  ;;  %v4772_v38 = vld [vmem:[#allocation11 + $0x1b4] ss:$8 sps:$4 sm:$0xff]  }
 0x4c7   : > { %2600 = vmatpush1.bf16.msra.mxu1 %v4800_v39  ;;  %v4770_v39 = vld [vmem:[#allocation11 + $0x1b0] ss:$8 sps:$4 sm:$0xff]  }
 0x4c8   : > { %2601 = vmatprep.subr.bf16.mxu1 %v4805_v40  ;;  %v4775_v40 = vld [vmem:[#allocation11 + $0x1c4] ss:$8 sps:$4 sm:$0xff]  }
 0x4cb   : > { %2602 = vmatpush1.bf16.msra.mxu1 %v4803_v41  ;;  %v4773_v41 = vld [vmem:[#allocation11 + $0x1c0] ss:$8 sps:$4 sm:$0xff]  }
 0x4cc   : > { %2603 = vmatprep.subr.bf16.mxu1 %v4808_v42  ;;  %v4778_v42 = vld [vmem:[#allocation11 + $0x1d4] ss:$8 sps:$4 sm:$0xff]  }
 0x4cf   : > { %2604 = vmatpush1.bf16.msra.mxu1 %v4806_v43  ;;  %v4776_v43 = vld [vmem:[#allocation11 + $0x1d0] ss:$8 sps:$4 sm:$0xff]  }
 0x4d0   : > { %2605 = vmatprep.subr.bf16.mxu1 %v4811_v44  ;;  %v4781_v44 = vld [vmem:[#allocation11 + $0x1e4] ss:$8 sps:$4 sm:$0xff]  }
 0x4d3   : > { %2606 = vmatpush1.bf16.msra.mxu1 %v4809_v45  ;;  %v4779_v45 = vld [vmem:[#allocation11 + $0x1e0] ss:$8 sps:$4 sm:$0xff]  }
 0x4d4   : > { %2607 = vmatprep.subr.bf16.mxu1 %v4814_v47  ;;  %v4784_v47 = vld [vmem:[#allocation11 + $0x1f4] ss:$8 sps:$4 sm:$0xff]  }
 0x4d7   : > { %2608 = vmatpush1.bf16.msra.mxu1 %v4812_v48  ;;  %v4782_v48 = vld [vmem:[#allocation11 + $0x1f0] ss:$8 sps:$4 sm:$0xff]  }
 0x4d8   : > { %2609 = vmatprep.subr.bf16.mxu1 %v4817_v46  ;;  %v4832_v46 = vld [vmem:[#allocation11 + $0xf4] ss:$8 sps:$4 sm:$0xff]  }
 0x4db   : > { %2610 = vmatpush1.bf16.msra.mxu1 %v4815_v49  ;;  %v4830_v49 = vld [vmem:[#allocation11 + $0xf0] ss:$8 sps:$4 sm:$0xff]  }
 0x4dc   : > { %2611 = vmatprep.subr.bf16.mxu1 %v4820_v51 }
 0x4df   : > { %2612 = vmatpush1.bf16.msra.mxu1 %v4818_v53 }
 0x4e0   : > { %2613 = vmatprep.subr.bf16.mxu1 %v4823_v56 }
 0x4e3   : > { %2614 = vmatpush1.bf16.msra.mxu1 %v4821_v63  ;;  %v2631_v63 = vld [vmem:[#allocation10 + $0x4] sm:$0x3] }
 0x4e4   : > { %2615 = vmatprep.subr.bf16.mxu1 %v4826_v2  ;;  %v4838_v2 = vld [vmem:[#allocation11 + $0x214] ss:$8 sps:$4 sm:$0xff]  }
 0x4e7   : > { %2616 = vmatpush1.bf16.msra.mxu1 %v4824_v6  ;;  %v4844_v6 = vld [vmem:[#allocation11 + $0x234] ss:$8 sps:$4 sm:$0xff]  }
 0x4e8   : > { %2617 = vmatprep.subr.bf16.mxu1 %v4829_v8  ;;  %v4847_v8 = vld [vmem:[#allocation11 + $0x244] ss:$8 sps:$4 sm:$0xff]  }
 0x4eb   : > { %2618 = vmatpush1.bf16.msra.mxu1 %v4827_v12  ;;  %v4853_v12 = vld [vmem:[#allocation11 + $0x264] ss:$8 sps:$4 sm:$0xff]  }
 0x4ec   : > { %2619 = vmatprep.subr.bf16.mxu1 %v4832_v46 }
 0x4ef   : > { %2620 = vmatpush1.bf16.msra.mxu1 %v4830_v49 }
 0x585   : > { %v2033_v54 = vpop.f32.mrb[28].mxu1 }
 0x586   : > { %v2040_v57 = vadd.f32 %v2033_v54, %v5727_v14  ;;  %v2035_v58 = vpop.f32.mrb[29].mxu1  ;;  %v2148_v14 = vld [vmem:[#allocation10 + $0x2] sm:$0x3] }
 0x587   : > { %v2041_v59 = vadd.f32 %v2035_v58, %v5729_v16  ;;  %v2037_v60 = vpop.f32.mrb[30].mxu1  ;;  %v4740_v16 = vld [vmem:[#allocation11 + $0x110] ss:$8 sps:$4 sm:$0xff]  }
 0x588   : > { %v2054_v61 = vadd.f32 %v2047_v52, %v2040_v57  ;;  %v2038_v62 = vpop.f32.mrb[31].mxu1 }
 0x589   : > { %v2055_v1 = vadd.f32 %v2051_v55, %v2041_v59  ;;  %v4835_v62 = vld [vmem:[#allocation11 + $0x204] ss:$8 sps:$4 sm:$0xff]  }
 0x58a   : > { %v2056_v3 = vmax.f32 %v2054_v61, 0.0 }
 0x58b   : > { %v2057_v4 = vmax.f32 %v2055_v1, 0.0  ;;  %v4833_v1 = vld [vmem:[#allocation11 + $0x200] ss:$8 sps:$4 sm:$0xff]  }
 0x58c   : > { %v2058_v5 = vpack.c.bf16 %v2056_v3, %v2056_v3  ;;  %v4836_v3 = vld [vmem:[#allocation11 + $0x210] ss:$8 sps:$4 sm:$0xff]  }
 0x58d   : > { %v5735_v7 = vpack.c.bf16 %v2057_v4, %v2057_v4  ;;  %v4841_v4 = vld [vmem:[#allocation11 + $0x224] ss:$8 sps:$4 sm:$0xff]  }
 0x58e   : > { %v5738_v9 = vsel %vm2065_vm4, %v2058_v5, 0  ;;  %v4839_v5 = vld [vmem:[#allocation11 + $0x220] ss:$8 sps:$4 sm:$0xff]  }
 0x58f   : > { %4029 = vmatprep.subr.msk.bf16.mxu0 %vm2065_vm4, %v5735_v7 }
 0x590   : > { %2073 = vmatpush1.bf16.msra.mxu0 %v5738_v9 }
 0x591   : > { %4031 = vmatprep.subr.msk.bf16.mxu0 %vm2065_vm4, %v5735_v7 }
 0x593   : > { %4030 = vmatmul.mubr.msk.bf16.vlgmr.msra.gmra.mrb[8].mxu0 %vm2061_vm5, %v2060_v10  ;;  %v4850_v10 = vld [vmem:[#allocation11 + $0x254] ss:$8 sps:$4 sm:$0xff]  }
 0x594   : > { %2153 = vmatpush1.bf16.msra.mxu0 %v5738_v9  ;;  %2184 = vmatprep.mubr.bf16.mxu0 %v5228_v23 }
 0x595   : > { %2388 = vmatprep.subr.bf16.mxu0 %v4739_v11  ;;  %v4848_v11 = vld [vmem:[#allocation11 + $0x250] ss:$8 sps:$4 sm:$0xff]  }
 0x59b   : > { %4032 = vmatmul.mubr.msk.bf16.vlgmr.msra.gmra.mrb[12].mxu0 %vm2061_vm5, %v2148_v14  ;;  %v4856_v14 = vld [vmem:[#allocation11 + $0x274] ss:$8 sps:$4 sm:$0xff]  }
 0x59c   : > { %2389 = vmatpush1.bf16.msra.mxu0 %v4737_v13  ;;  %v4851_v13 = vld [vmem:[#allocation11 + $0x260] ss:$8 sps:$4 sm:$0xff]  }
 0x59d   : > { %2390 = vmatprep.subr.bf16.mxu0 %v4742_v15  ;;  %v4854_v15 = vld [vmem:[#allocation11 + $0x270] ss:$8 sps:$4 sm:$0xff]  }
 0x5a0   : > { %2391 = vmatpush1.bf16.msra.mxu0 %v4740_v16  ;;  %v4859_v16 = vld [vmem:[#allocation11 + $0x284] ss:$8 sps:$4 sm:$0xff]  }
 0x5a1   : > { %2392 = vmatprep.subr.bf16.mxu0 %v4745_v17  ;;  %v4857_v17 = vld [vmem:[#allocation11 + $0x280] ss:$8 sps:$4 sm:$0xff]  }
 0x5a4   : > { %2393 = vmatpush1.bf16.msra.mxu0 %v4743_v18  ;;  %v4862_v18 = vld [vmem:[#allocation11 + $0x294] ss:$8 sps:$4 sm:$0xff]  }
 0x5a5   : > { %2394 = vmatprep.subr.bf16.mxu0 %v4748_v19  ;;  %v4860_v19 = vld [vmem:[#allocation11 + $0x290] ss:$8 sps:$4 sm:$0xff]  }
 0x5a8   : > { %2395 = vmatpush1.bf16.msra.mxu0 %v4746_v20  ;;  %v4865_v20 = vld [vmem:[#allocation11 + $0x2a4] ss:$8 sps:$4 sm:$0xff]  }
 0x5a9   : > { %2396 = vmatprep.subr.bf16.mxu0 %v4751_v21  ;;  %v4863_v21 = vld [vmem:[#allocation11 + $0x2a0] ss:$8 sps:$4 sm:$0xff]  }
 0x5ac   : > { %2397 = vmatpush1.bf16.msra.mxu0 %v4749_v24  ;;  %v4868_v24 = vld [vmem:[#allocation11 + $0x2b4] ss:$8 sps:$4 sm:$0xff]  }
 0x5ad   : > { %2398 = vmatprep.subr.bf16.mxu0 %v4754_v26  ;;  %v4866_v26 = vld [vmem:[#allocation11 + $0x2b0] ss:$8 sps:$4 sm:$0xff]  }
 0x5b0   : > { %2399 = vmatpush1.bf16.msra.mxu0 %v4752_v27  ;;  %v4869_v27 = vld [vmem:[#allocation11 + $0x2c0] ss:$8 sps:$4 sm:$0xff]  }
 0x5b1   : > { %2400 = vmatprep.subr.bf16.mxu0 %v4757_v28  ;;  %v4871_v28 = vld [vmem:[#allocation11 + $0x2c4] ss:$8 sps:$4 sm:$0xff]  }
 0x5b4   : > { %2401 = vmatpush1.bf16.msra.mxu0 %v4755_v29  ;;  %v4874_v29 = vld [vmem:[#allocation11 + $0x2d4] ss:$8 sps:$4 sm:$0xff]  }
 0x5b5   : > { %2402 = vmatprep.subr.bf16.mxu0 %v4760_v30  ;;  %v4872_v30 = vld [vmem:[#allocation11 + $0x2d0] ss:$8 sps:$4 sm:$0xff]  }
 0x5b8   : > { %2403 = vmatpush1.bf16.msra.mxu0 %v4758_v31  ;;  %v4875_v31 = vld [vmem:[#allocation11 + $0x2e0] ss:$8 sps:$4 sm:$0xff]  }
 0x5b9   : > { %2404 = vmatprep.subr.bf16.mxu0 %v4763_v32  ;;  %v4877_v32 = vld [vmem:[#allocation11 + $0x2e4] ss:$8 sps:$4 sm:$0xff]  }
 0x5bc   : > { %2405 = vmatpush1.bf16.msra.mxu0 %v4761_v33  ;;  %v4880_v33 = vld [vmem:[#allocation11 + $0x2f4] ss:$8 sps:$4 sm:$0xff]  }
 0x5bd   : > { %2406 = vmatprep.subr.bf16.mxu0 %v4766_v34  ;;  %v4878_v34 = vld [vmem:[#allocation11 + $0x2f0] ss:$8 sps:$4 sm:$0xff]  }
 0x5c0   : > { %2407 = vmatpush1.bf16.msra.mxu0 %v4764_v35 }
 0x5c1   : > { %2408 = vmatprep.subr.bf16.mxu0 %v4769_v36 }
 0x5c4   : > { %2409 = vmatpush1.bf16.msra.mxu0 %v4767_v37 }
 0x5c5   : > { %2410 = vmatprep.subr.bf16.mxu0 %v4772_v38 }
 0x5c8   : > { %2411 = vmatpush1.bf16.msra.mxu0 %v4770_v39 }
 0x5c9   : > { %2412 = vmatprep.subr.bf16.mxu0 %v4775_v40 }
 0x5cc   : > { %2413 = vmatpush1.bf16.msra.mxu0 %v4773_v41 }
 0x5cd   : > { %2414 = vmatprep.subr.bf16.mxu0 %v4778_v42 }
 0x5d0   : > { %2415 = vmatpush1.bf16.msra.mxu0 %v4776_v43 }
 0x5d1   : > { %2416 = vmatprep.subr.bf16.mxu0 %v4781_v44 }
 0x5d4   : > { %2417 = vmatpush1.bf16.msra.mxu0 %v4779_v45 }
 0x5d5   : > { %2418 = vmatprep.subr.bf16.mxu0 %v4784_v47 }
 0x5d8   : > { %2419 = vmatpush1.bf16.msra.mxu0 %v4782_v48 }
 0x5d9   : > { %4097 = vmatprep.subr.msk.bf16.mxu0 %vm2065_vm4, %v5735_v7  ;;  %v4842_v7 = vld [vmem:[#allocation11 + $0x230] ss:$8 sps:$4 sm:$0xff]  }
 0x666   : > { %v2106_v50 = vpop.f32.mrb[8].mxu0 }
 0x667   : > { %v2108_v51 = vpop.f32.mrb[9].mxu0  ;;  %v2113_v54 = vpack.c.bf16 %v2106_v50, %v2106_v50 }
 0x668   : > { %v2114_v52 = vpack.c.bf16 %v2108_v51, %v2108_v51  ;;  %v2110_v53 = vpop.f32.mrb[10].mxu0  ;;  %v2914_v51 = vld [vmem:[%s6006_s9] sm:$0x3] }
 0x669   : > { %v2111_v55 = vpop.f32.mrb[11].mxu0 }
 0x66a   : > { %2621 = vmatprep.mubr.bf16.mxu1 %v2114_v52  ;;  %v2919_v52 = vrot.slane %v2914_v51, %v5702_v22  ;;  %v2932_v22 = vld [vmem:[%s6007_s10] sm:$0x1] }
 0x66b   : > { %2622 = vmatmul.mubr.bf16.vlgmr.msra.gmra.mrb[32].mxu1 %v2113_v54  ;;  %v2923_v54 = vrot.slane %v2914_v51, %v5707_v25  ;;  %v4881_v25 = vld [vmem:[%s6008_s11 + $0xc0] sm:$0xff]  }
 0x66c   : > { %2976 = vmatprep.mubr.bf16.mxu1 %v5228_v23  ;;  %v4914_v51 = vld [vmem:[%s6010_s13 + $0x40] sm:$0xff]  }
 0x66e   : > { %v2186_v56 = vpop.f32.mrb[12].mxu0 }
 0x66f   : > { %v2188_v57 = vpop.f32.mrb[13].mxu0  ;;  %v2193_v60 = vpack.c.bf16 %v2186_v56, %v2186_v56 }
 0x670   : > { %v2194_v58 = vpack.c.bf16 %v2188_v57, %v2188_v57  ;;  %v2190_v59 = vpop.f32.mrb[14].mxu0 }
 0x671   : > { %v2191_v61 = vpop.f32.mrb[15].mxu0 }
 0x672   : > { %2420 = vmatprep.mubr.bf16.mxu0 %v2194_v58 }
 0x673   : > { %2421 = vmatmul.mubr.bf16.vlgmr.msra.gmra.mrb[16].mxu0 %v2193_v60 }
 0x674   : > { %2636 = vmatpush1.bf16.msra.mxu0 %v5738_v9  ;;  %2667 = vmatprep.mubr.bf16.mxu0 %v5228_v23  ;;  %v4845_v9 = vld [vmem:[#allocation11 + $0x240] ss:$8 sps:$4 sm:$0xff]  }
 0x675   : > { %2871 = vmatprep.subr.bf16.mxu0 %v4835_v62 }
 0x67b   : > { %4098 = vmatmul.mubr.msk.bf16.vlgmr.msra.gmra.mrb[20].mxu0 %vm2061_vm5, %v2631_v63 }
 0x67c   : > { %2872 = vmatpush1.bf16.msra.mxu0 %v4833_v1 }
 0x67d   : > { %2873 = vmatprep.subr.bf16.mxu0 %v4838_v2 }
 0x680   : > { %2874 = vmatpush1.bf16.msra.mxu0 %v4836_v3 }
 0x681   : > { %2875 = vmatprep.subr.bf16.mxu0 %v4841_v4  ;;  %v4133_v4 = vld [vmem:[%s6007_s10 + $0x1] sm:$0x1] }
 0x684   : > { %2876 = vmatpush1.bf16.msra.mxu0 %v4839_v5  ;;  %v4882_v5 = vld [vmem:[%s6008_s11 + $0x80] sm:$0xff]  }
 0x685   : > { %2877 = vmatprep.subr.bf16.mxu0 %v4844_v6  ;;  %v4883_v6 = vld [vmem:[%s6008_s11 + $0xc8] sm:$0xff]  }
 0x688   : > { %2878 = vmatpush1.bf16.msra.mxu0 %v4842_v7  ;;  %v4884_v7 = vld [vmem:[%s6008_s11 + $0x88] sm:$0xff]  }
 0x689   : > { %2879 = vmatprep.subr.bf16.mxu0 %v4847_v8  ;;  %v4886_v8 = vld [vmem:[%s6008_s11 + $0x90] sm:$0xff]  }
 0x68c   : > { %2880 = vmatpush1.bf16.msra.mxu0 %v4845_v9  ;;  %v4887_v9 = vld [vmem:[%s6008_s11 + $0xd8] sm:$0xff]  }
 0x68d   : > { %2881 = vmatprep.subr.bf16.mxu0 %v4850_v10  ;;  %v4888_v10 = vld [vmem:[%s6008_s11 + $0x98] sm:$0xff]  }
 0x690   : > { %2882 = vmatpush1.bf16.msra.mxu0 %v4848_v11  ;;  %v4889_v11 = vld [vmem:[%s6008_s11 + $0xe0] sm:$0xff]  }
 0x691   : > { %2883 = vmatprep.subr.bf16.mxu0 %v4853_v12  ;;  %v4890_v12 = vld [vmem:[%s6008_s11 + $0xa0] sm:$0xff]  }
 0x694   : > { %2884 = vmatpush1.bf16.msra.mxu0 %v4851_v13  ;;  %v4891_v13 = vld [vmem:[%s6008_s11 + $0xe8] sm:$0xff]  }
 0x695   : > { %2885 = vmatprep.subr.bf16.mxu0 %v4856_v14  ;;  %v4892_v14 = vld [vmem:[%s6008_s11 + $0xa8] sm:$0xff]  }
 0x698   : > { %2886 = vmatpush1.bf16.msra.mxu0 %v4854_v15  ;;  %v4893_v15 = vld [vmem:[%s6008_s11 + $0xf0] sm:$0xff]  }
 0x699   : > { %2887 = vmatprep.subr.bf16.mxu0 %v4859_v16  ;;  %v4894_v16 = vld [vmem:[%s6008_s11 + $0xb0] sm:$0xff]  }
 0x69c   : > { %2888 = vmatpush1.bf16.msra.mxu0 %v4857_v17  ;;  %v4895_v17 = vld [vmem:[%s6008_s11 + $0xf8] sm:$0xff]  }
 0x69d   : > { %2889 = vmatprep.subr.bf16.mxu0 %v4862_v18  ;;  %v4896_v18 = vld [vmem:[%s6008_s11 + $0xb8] sm:$0xff]  }
 0x6a0   : > { %2890 = vmatpush1.bf16.msra.mxu0 %v4860_v19  ;;  %v4897_v19 = vld [vmem:[%s6008_s11 + $0x40] sm:$0xff]  }
 0x6a1   : > { %2891 = vmatprep.subr.bf16.mxu0 %v4865_v20 }
 0x6a4   : > { %2892 = vmatpush1.bf16.msra.mxu0 %v4863_v21 }
 0x6a5   : > { %2893 = vmatprep.subr.bf16.mxu0 %v4868_v24 }
 0x6a8   : > { %2894 = vmatpush1.bf16.msra.mxu0 %v4866_v26 }
 0x6a9   : > { %2895 = vmatprep.subr.bf16.mxu0 %v4871_v28 }
 0x6ac   : > { %2896 = vmatpush1.bf16.msra.mxu0 %v4869_v27 }
 0x6ad   : > { %2897 = vmatprep.subr.bf16.mxu0 %v4874_v29 }
 0x6b0   : > { %2898 = vmatpush1.bf16.msra.mxu0 %v4872_v30 }
 0x6b1   : > { %2899 = vmatprep.subr.bf16.mxu0 %v4877_v32 }
 0x6b4   : > { %2900 = vmatpush1.bf16.msra.mxu0 %v4875_v31  ;;  %v4898_v31 = vld [vmem:[%s6008_s11] sm:$0xff]  }
 0x6b5   : > { %2901 = vmatprep.subr.bf16.mxu0 %v4880_v33 }
 0x6b8   : > { %2902 = vmatpush1.bf16.msra.mxu0 %v4878_v34  ;;  %v4899_v34 = vld [vmem:[%s6008_s11 + $0x48] sm:$0xff]  }
 0x6b9   : > { %4349 = vmatprep.subr.bf16.mxu0 %v5226_v0 }
 0x73e   : > { %v2623_v35 = vpop.f32.mrb[32].mxu1 }
 0x73f   : > { %v2625_v36 = vpop.f32.mrb[33].mxu1 }
 0x740   : > { %v2627_v37 = vpop.f32.mrb[34].mxu1 }
 0x741   : > { %v2628_v38 = vpop.f32.mrb[35].mxu1  ;;  %v4901_v37 = vld [vmem:[%s6008_s11 + $0x50] sm:$0xff]  }
 0x742   : > { %v4902_v38 = vld [vmem:[%s6008_s11 + $0x10] sm:$0xff]  }
 0x746   : > { %v2422_v39 = vpop.f32.mrb[16].mxu0 }
 0x747   : > { %v2624_v40 = vadd.f32 %v2623_v35, %v2422_v39  ;;  %v2424_v41 = vpop.f32.mrb[17].mxu0  ;;  %v4903_v39 = vld [vmem:[%s6008_s11 + $0x58] sm:$0xff]  }
 0x748   : > { %v2626_v42 = vadd.f32 %v2625_v36, %v2424_v41  ;;  %v2426_v43 = vpop.f32.mrb[18].mxu0  ;;  %v4900_v36 = vld [vmem:[%s6008_s11 + $0x8] sm:$0xff]   ;;  %v4905_v41 = vld [vmem:[%s6008_s11 + $0x60] sm:$0xff]  }
 0x749   : > { %v2427_v44 = vpop.f32.mrb[19].mxu0  ;;  %v4907_v43 = vld [vmem:[%s6008_s11 + $0x68] sm:$0xff]  }
 0x74a   : > { %v4908_v44 = vld [vmem:[%s6008_s11 + $0x28] sm:$0xff]  }
 0x74e   : > { %v2669_v45 = vpop.f32.mrb[20].mxu0 }
 0x74f   : > { %v2671_v47 = vpop.f32.mrb[21].mxu0  ;;  %v2676_v49 = vpack.c.bf16 %v2669_v45, %v2669_v45  ;;  %v4909_v45 = vld [vmem:[%s6008_s11 + $0x70] sm:$0xff]  }
 0x750   : > { %v2677_v48 = vpack.c.bf16 %v2671_v47, %v2671_v47  ;;  %v2673_v46 = vpop.f32.mrb[22].mxu0  ;;  %v4910_v47 = vld [vmem:[%s6008_s11 + $0x30] sm:$0xff]  }
 0x751   : > { %v2674_v50 = vpop.f32.mrb[23].mxu0  ;;  %v4912_v46 = vld [vmem:[%s6008_s11 + $0x38] sm:$0xff]  }
 0x752   : > { %2903 = vmatprep.mubr.bf16.mxu0 %v2677_v48  ;;  %v4911_v48 = vld [vmem:[%s6008_s11 + $0x78] sm:$0xff]   ;;  %v4913_v50 = vld [vmem:[%s6010_s13] sm:$0xff]  }
 0x753   : > { %2904 = vmatmul.mubr.bf16.vlgmr.msra.gmra.mrb[24].mxu0 %v2676_v49 }
 0x754   : > { %4365 = vmatprep.mubr.msk.bf16.mxu0 %vm5227_vm0, %v5226_v0  ;;  %4350 = vmatpush3.bf16.msra.mxu0 %v4914_v51 }
 0x755   : > { %4351 = vmatprep.subr.bf16.mxu0 %v5226_v0 }
 0x826   : > { %v2905_v53 = vpop.f32.mrb[24].mxu0 }
 0x827   : > { %v2912_v55 = vadd.f32 %v2905_v53, %v2624_v40  ;;  %v2907_v56 = vpop.f32.mrb[25].mxu0  ;;  %v4904_v40 = vld [vmem:[%s6008_s11 + $0x18] sm:$0xff]   ;;  %v4916_v53 = vld [vmem:[%s6010_s13 + $0x48] sm:$0xff]  }
 0x828   : > { %v2913_v57 = vadd.f32 %v2907_v56, %v2626_v42  ;;  %v2909_v58 = vpop.f32.mrb[26].mxu0  ;;  %v4906_v42 = vld [vmem:[%s6008_s11 + $0x20] sm:$0xff]   ;;  %4352 = vmatpush3.bf16.msra.mxu0 %v4916_v53  ;;  %v4919_v56 = vld [vmem:[%s6010_s13 + $0x18] sm:$0xff]  }
 0x829   : > { %v2926_v59 = vadd.f32 %v2919_v52, %v2912_v55  ;;  %v2910_v60 = vpop.f32.mrb[27].mxu0  ;;  %v4915_v52 = vld [vmem:[%s6010_s13 + $0x8] sm:$0xff]   ;;  %v4918_v55 = vld [vmem:[%s6010_s13 + $0x50] sm:$0xff]   ;;  %4353 = vmatprep.subr.bf16.mxu0 %v5226_v0  ;;  %v4921_v58 = vld [vmem:[%s6010_s13 + $0x20] sm:$0xff]  }
 0x82a   : > { %v2927_v61 = vadd.f32 %v2923_v54, %v2913_v57  ;;  %v4917_v54 = vld [vmem:[%s6010_s13 + $0x10] sm:$0xff]   ;;  %v4920_v57 = vld [vmem:[%s6010_s13 + $0x58] sm:$0xff]   ;;  %v4923_v60 = vld [vmem:[%s6010_s13 + $0x28] sm:$0xff]  }
 0x82b   : > { %v2928_v62 = vmax.f32 %v2926_v59, 0.0  ;;  %v4922_v59 = vld [vmem:[%s6010_s13 + $0x60] sm:$0xff]  }
 0x82c   : > { %v2929_v63 = vmax.f32 %v2927_v61, 0.0  ;;  %4354 = vmatpush3.bf16.msra.mxu0 %v4918_v55  ;;  %v4924_v61 = vld [vmem:[%s6010_s13 + $0x68] sm:$0xff]  }
 0x82d   : > { %v2930_v1 = vpack.c.bf16 %v2928_v62, %v2928_v62  ;;  %4355 = vmatprep.subr.bf16.mxu0 %v5226_v0  ;;  %v4925_v62 = vld [vmem:[%s6010_s13 + $0x30] sm:$0xff]  }
 0x82e   : > { %v2931_v2 = vpack.c.bf16 %v2929_v63, %v2929_v63  ;;  %v4926_v63 = vld [vmem:[%s6010_s13 + $0x70] sm:$0xff]  }
 0x82f   : > { %v2939_v3 = vsel %vm2937_vm6, %v2930_v1, 0  ;;  %v4927_v1 = vld [vmem:[%s6010_s13 + $0x38] sm:$0xff]  }
 0x830   : > { %4131 = vmatprep.subr.msk.bf16.mxu1 %vm2937_vm6, %v2931_v2  ;;  %4356 = vmatpush3.bf16.msra.mxu0 %v4920_v57 }
 0x831   : > { %2945 = vmatpush1.bf16.msra.mxu1 %v2939_v3  ;;  %4357 = vmatprep.subr.bf16.mxu0 %v5226_v0 }
 0x832   : > { %4134 = vmatprep.subr.msk.bf16.mxu1 %vm2937_vm6, %v2931_v2  ;;  %v4928_v2 = vld [vmem:[%s6010_s13 + $0x78] sm:$0xff]  }
 0x834   : > { %4132 = vmatmul.mubr.msk.bf16.vlgmr.msra.gmra.mrb[36].mxu1 %vm2933_vm7, %v2932_v22  ;;  %4358 = vmatpush3.bf16.msra.mxu0 %v4922_v59 }
 0x835   : > { %3025 = vmatpush1.bf16.msra.mxu1 %v2939_v3  ;;  %3056 = vmatprep.mubr.bf16.mxu1 %v5228_v23  ;;  %v4885_v23 = vld [vmem:[%s6008_s11 + $0xd0] sm:$0xff]  }
 0x836   : > { %4254 = vmatprep.subr.bf16.mxu1 %v4881_v25  ;;  %4359 = vmatprep.subr.bf16.mxu0 %v5226_v0 }
 0x838   : > { %4360 = vmatpush3.bf16.msra.mxu0 %v4924_v61 }
 0x839   : > { %4361 = vmatprep.subr.bf16.mxu0 %v5226_v0 }
 0x83c   : > { %4135 = vmatmul.mubr.msk.bf16.vlgmr.msra.gmra.mrb[40].mxu1 %vm2933_vm7, %v4133_v4  ;;  %4362 = vmatpush3.bf16.msra.mxu0 %v4926_v63 }
 0x83d   : > { %4255 = vmatpush3.bf16.msra.mxu1 %v4882_v5  ;;  %4363 = vmatprep.subr.bf16.mxu0 %v5226_v0 }
 0x83e   : > { %4256 = vmatprep.subr.bf16.mxu1 %v4883_v6 }
 0x840   : > { %4364 = vmatpush3.bf16.msra.mxu0 %v4928_v2 }
 0x841   : > { %4257 = vmatpush3.bf16.msra.mxu1 %v4884_v7  ;;  %4389 = vmatprep.subr.bf16.mxu0 %v5226_v0 }
 0x842   : > { %4258 = vmatprep.subr.bf16.mxu1 %v4885_v23 }
 0x845   : > { %4259 = vmatpush3.bf16.msra.mxu1 %v4886_v8 }
 0x846   : > { %4260 = vmatprep.subr.bf16.mxu1 %v4887_v9  ;;  %v4200_v9 = vld [vmem:[%s6009_s12] ss:$0 sm:$0xff] }
 0x849   : > { %4261 = vmatpush3.bf16.msra.mxu1 %v4888_v10 }
 0x84a   : > { %4262 = vmatprep.subr.bf16.mxu1 %v4889_v11 }
 0x84d   : > { %4263 = vmatpush3.bf16.msra.mxu1 %v4890_v12 }
 0x84e   : > { %4264 = vmatprep.subr.bf16.mxu1 %v4891_v13 }
 0x851   : > { %4265 = vmatpush3.bf16.msra.mxu1 %v4892_v14 }
 0x852   : > { %4266 = vmatprep.subr.bf16.mxu1 %v4893_v15  ;;  %v4929_v15 = vld [vmem:[#allocation13] sm:$0xff]  }
 0x855   : > { %4267 = vmatpush3.bf16.msra.mxu1 %v4894_v16 }
 0x856   : > { %4268 = vmatprep.subr.bf16.mxu1 %v4895_v17  ;;  %v4930_v17 = vld [vmem:[#allocation13 + $0x8] sm:$0xff]  }
 0x859   : > { %4269 = vmatpush3.bf16.msra.mxu1 %v4896_v18  ;;  %v4931_v18 = vld [vmem:[#allocation13 + $0x10] sm:$0xff]  }
 0x85a   : > { %4276 = vmatprep.subr.bf16.mxu1 %v4897_v19  ;;  %v4932_v19 = vld [vmem:[#allocation13 + $0x18] sm:$0xff]  }
 0x907   : > { %v2978_v20 = vpop.f32.mrb[36].mxu1 }
 0x908   : > { %v2980_v21 = vpop.f32.mrb[37].mxu1  ;;  %v2985_v49 = vpack.c.bf16 %v2978_v20, %v2978_v20  ;;  %v4933_v20 = vld [vmem:[#allocation13 + $0x20] sm:$0xff]  }
 0x909   : > { %v2982_v24 = vpop.f32.mrb[38].mxu1  ;;  %v2986_v35 = vpack.c.bf16 %v2980_v21, %v2980_v21  ;;  %v4934_v21 = vld [vmem:[#allocation13 + $0x28] sm:$0xff]  }
 0x90a   : > { %v2983_v26 = vpop.f32.mrb[39].mxu1  ;;  %v4935_v24 = vld [vmem:[#allocation13 + $0x30] sm:$0xff]  }
 0x90b   : > { %v4936_v26 = vld [vmem:[#allocation13 + $0x38] sm:$0xff]  }
 0x90f   : > { %v3058_v27 = vpop.f32.mrb[40].mxu1 }
 0x910   : > { %v3060_v28 = vpop.f32.mrb[41].mxu1  ;;  %v3065_v32 = vpack.c.bf16 %v3058_v27, %v3058_v27 }
 0x911   : > { %v3066_v29 = vpack.c.bf16 %v3060_v28, %v3060_v28  ;;  %v3062_v30 = vpop.f32.mrb[42].mxu1 }
 0x912   : > { %v3063_v33 = vpop.f32.mrb[43].mxu1  ;;  %v3595_v30 = vld [vmem:[%s6074_s26] sm:$0x1] }
 0x913   : > { %3228 = vmatprep.mubr.bf16.mxu1 %v3066_v29 }
 0x914   : > { %3229 = vmatmul.mubr.bf16.vlgmr.msra.gmra.mrb[44].mxu1 %v3065_v32 }
 0x915   : > { %4277 = vmatpush3.bf16.msra.mxu1 %v4898_v31  ;;  %3364 = vmatprep.mubr.bf16.mxu1 %v2986_v35 }
 0x916   : > { %4278 = vmatprep.subr.bf16.mxu1 %v4899_v34 }
 0x919   : > { %4279 = vmatpush3.bf16.msra.mxu1 %v4900_v36 }
 0x91a   : > { %4280 = vmatprep.subr.bf16.mxu1 %v4901_v37 }
 0x91d   : > { %4281 = vmatpush3.bf16.msra.mxu1 %v4902_v38 }
 0x91e   : > { %4282 = vmatprep.subr.bf16.mxu1 %v4903_v39 }
 0x921   : > { %4283 = vmatpush3.bf16.msra.mxu1 %v4904_v40 }
 0x922   : > { %4284 = vmatprep.subr.bf16.mxu1 %v4905_v41 }
 0x925   : > { %4285 = vmatpush3.bf16.msra.mxu1 %v4906_v42 }
 0x926   : > { %4286 = vmatprep.subr.bf16.mxu1 %v4907_v43 }
 0x929   : > { %4287 = vmatpush3.bf16.msra.mxu1 %v4908_v44 }
 0x92a   : > { %4288 = vmatprep.subr.bf16.mxu1 %v4909_v45 }
 0x92d   : > { %4289 = vmatpush3.bf16.msra.mxu1 %v4910_v47 }
 0x92e   : > { %4290 = vmatprep.subr.bf16.mxu1 %v4911_v48 }
 0x931   : > { %4291 = vmatpush3.bf16.msra.mxu1 %v4912_v46 }
 0x932   : > { %4369 = vmatprep.subr.bf16.mxu1 %v5226_v0 }
 0x934   : > { %3365 = vmatmul.mubr.bf16.vlgmr.msra.gmra.mrb[48].mxu1 %v2985_v49 }
 0x935   : > { %4385 = vmatprep.mubr.msk.bf16.mxu1 %vm5227_vm0, %v5226_v0  ;;  %4370 = vmatpush3.bf16.msra.mxu1 %v4913_v50 }
 0x936   : > { %4371 = vmatprep.subr.bf16.mxu1 %v5226_v0 }
 0x939   : > { %4372 = vmatpush3.bf16.msra.mxu1 %v4915_v52 }
 0x93a   : > { %4373 = vmatprep.subr.bf16.mxu1 %v5226_v0 }
 0x93d   : > { %4374 = vmatpush3.bf16.msra.mxu1 %v4917_v54 }
 0x93e   : > { %4375 = vmatprep.subr.bf16.mxu1 %v5226_v0 }
 0x941   : > { %4376 = vmatpush3.bf16.msra.mxu1 %v4919_v56 }
 0x942   : > { %4377 = vmatprep.subr.bf16.mxu1 %v5226_v0 }
 0x945   : > { %4378 = vmatpush3.bf16.msra.mxu1 %v4921_v58 }
 0x946   : > { %4379 = vmatprep.subr.bf16.mxu1 %v5226_v0 }
 0x949   : > { %4380 = vmatpush3.bf16.msra.mxu1 %v4923_v60 }
 0x94a   : > { %4381 = vmatprep.subr.bf16.mxu1 %v5226_v0 }
 0x94d   : > { %4382 = vmatpush3.bf16.msra.mxu1 %v4925_v62 }
 0x94e   : > { %4383 = vmatprep.subr.bf16.mxu1 %v5226_v0 }
 0x951   : > { %4384 = vmatpush3.bf16.msra.mxu1 %v4927_v1 }
 0x9e7   : > { %v4270_v3 = vpop.f32.mrb[44].mxu1 }
 0x9e8   : > { %v4271_v22 = vpop.f32.mrb[45].mxu1 }
 0x9e9   : > { %v4272_v25 = vadd.f32 %v4271_v22, %v4270_v3  ;;  %v4273_v4 = vpop.f32.mrb[46].mxu1 }
 0x9ea   : > { %v4274_v5 = vpop.f32.mrb[47].mxu1 }
 0xa07   : > { %v4292_v6 = vpop.f32.mrb[48].mxu1 }
 0xa08   : > { %v4293_v7 = vpop.f32.mrb[49].mxu1 }
 0xa09   : > { %v4294_v23 = vadd.f32 %v4293_v7, %v4292_v6  ;;  %v4295_v8 = vpop.f32.mrb[50].mxu1 }
 0xa0a   : > { %v4296_v10 = vpop.f32.mrb[51].mxu1 }
 0xa0b   : > { %v3367_v11 = vadd.f32 %v4294_v23, %v4272_v25 }
 0xa0d   : > { %v3379_v12 = vadd.f32 %v4200_v9, %v3367_v11 }
 0xa0f   : > { %v3380_v13 = vmax.f32 %v3379_v12, 0.0 }
 0xa11   : > { %v3381_v14 = vpack.c.bf16 %v3380_v13, %v3380_v13 }
 0xa13   : > { %4386 = vmatmul.mubr.bf16.vlgmr.msra.gmra.mrb[52].mxu1 %v3381_v14  ;;  %v3416_v16 = vshrl.u32 %v3381_v14, 16 }
 0xa15   : > { %4366 = vmatmul.mubr.bf16.vlgmr.msra.gmra.mrb[28].mxu0 %v3416_v16 }
 0xa16   : > { %4390 = vmatpush3.bf16.msra.mxu0 %v4929_v15  ;;  %4405 = vmatprep.mubr.msk.bf16.mxu0 %vm5227_vm0, %v5226_v0 }
 0xa17   : > { %4391 = vmatprep.subr.bf16.mxu0 %v5226_v0 }
 0xa1a   : > { %4392 = vmatpush3.bf16.msra.mxu0 %v4930_v17 }
 0xa1b   : > { %4393 = vmatprep.subr.bf16.mxu0 %v5226_v0 }
 0xa1e   : > { %4394 = vmatpush3.bf16.msra.mxu0 %v4931_v18 }
 0xa1f   : > { %4395 = vmatprep.subr.bf16.mxu0 %v5226_v0 }
 0xa22   : > { %4396 = vmatpush3.bf16.msra.mxu0 %v4932_v19 }
 0xa23   : > { %4397 = vmatprep.subr.bf16.mxu0 %v5226_v0 }
 0xa26   : > { %4398 = vmatpush3.bf16.msra.mxu0 %v4933_v20 }
 0xa27   : > { %4399 = vmatprep.subr.bf16.mxu0 %v5226_v0 }
 0xa2a   : > { %4400 = vmatpush3.bf16.msra.mxu0 %v4934_v21 }
 0xa2b   : > { %4401 = vmatprep.subr.bf16.mxu0 %v5226_v0 }
 0xa2e   : > { %4402 = vmatpush3.bf16.msra.mxu0 %v4935_v24 }
 0xa2f   : > { %4403 = vmatprep.subr.bf16.mxu0 %v5226_v0  ;;  %v3614_v0 = vld [vmem:[%s6075_s21] sm:$0x1] }
 0xa32   : > { %4404 = vmatpush3.bf16.msra.mxu0 %v4936_v26 }
 0xae6   : > { %v3589_v27 = vpop.f32.mrb[52].mxu1 }
 0xae7   : > { %v4387_v28 = vpop.f32.mrb[53].mxu1 }
 0xae8   : > { %v3501_v29 = vpop.f32.mrb[28].mxu0  ;;  %v3592_v31 = vpop.f32.mrb[54].mxu1 }
 0xae9   : > { %v3590_v32 = vadd.f32 %v3589_v27, %v3501_v29  ;;  %v4367_v33 = vpop.f32.mrb[29].mxu0  ;;  %v4388_v34 = vpop.f32.mrb[55].mxu1 }
 0xaea   : > { %v3504_v35 = vpop.f32.mrb[30].mxu0 }
 0xaeb   : > { %v3596_v36 = vadd.f32 %v3595_v30, %v3590_v32  ;;  %v4368_v37 = vpop.f32.mrb[31].mxu0 }
 0xaed   : > { %v3597_v38 = vpack.c.bf16 %v3596_v36, %v3596_v36 }
 0xaef   : > { %4406 = vmatmul.mubr.bf16.vlgmr.msra.gmra.mrb[32].mxu0 %v3597_v38 }
 0xbc2   : > { %v3697_v39 = vpop.f32.mrb[32].mxu0 }
 0xbc3   : > { %v3698_v40 = vadd.f32 %v3697_v39, %v3614_v0  ;;  %v4407_v41 = vpop.f32.mrb[33].mxu0 }
 0xbc4   : > { %v3700_v42 = vpop.f32.mrb[34].mxu0 }
 0xbc5   : > { %3703 = vst [vmem:[%s640_s4] sm:$0x1] %v3698_v40  ;;  %v4408_v43 = vpop.f32.mrb[35].mxu0 }
 0xbc6   : > { %5146 = shalt.err (!%p5143_p9)
}
 0xbc7   : > { %s5147_s0 = scalar_lea.hbm %s5955_s24, 16  ;;  %s5151_s18 = scalar_lea.hbm %s6077_s30, 32 }
 0xbc8   : > { %p5148_p10 = scmp.ne.s32.totalorder %s5955_s24, %s5147_s0  ;;  %p5152_p1 = scmp.lt.u32.totalorder %s5955_s24, %s6077_s30 }
 0xbc9   : > { %p5153_p2 = scmp.lt.u32.totalorder %s5151_s18, %s5147_s0  ;;  %p5155_p4 = scmp.lt.u32.totalorder %s5147_s0, %s5955_s24 }
 0xbca   : > { %p5149_p13 = pnand %p5148_p10, %p6078_p7 }
 0xbcb   : > { %p5154_p3 = por %p5153_p2, %p5152_p1 }
 0xbcc   : > { %p5150_p12 = pneg %p5149_p13 }
 0xbcd   : > { %p5156_p8 = por %p5155_p4, %p5154_p3 }
 0xbcf   : > { %p5157_p11 = pnand %p5156_p8, %p5150_p12 }
 0xbd1   : > { %5160 = shalt.err (!%p5157_p11)
}
 0xbd2   : > { %4445 = dma.vmem_to_hbm [thread:$0]  (%p6078_p7), %s5957_s19, 16, %s5955_s24, %s3705_s14  }
 0xbd3 PF: > { %s6079_s21 = sld [smem:[#allocation22_spill]]  ;;  %s6080_s22 = sld [smem:[#allocation20_spill]] }
 0xbd4   : > { %s6081_s4 = sld [smem:[#allocation26_spill]] }
 0xbd9   : > { %p4487_p5 = scmp.ge.s32.totalorder %s6079_s21, 2  ;;  %s3729_s8 = sand.u32 1, %s6080_s22  }
 0xbda   : > { %p6082_p0 = scmp.ne.s32.totalorder %s6081_s4, 0  ;;  %s3730_s17 = scalar_lea.sflag [#allocation4], %s3729_s8 }
 0xbdc   : > { %p4470_p6 = pnand %p4487_p5, %p6082_p0 }
 0xbde   : > { %5194 = dma.done.wait (!%p4470_p6), %s3730_s17, 16  }
 0xbdf   : > { %5196 = vsyncadd (!%p4470_p6), %s3730_s17, 4294967280  ;;  %s6083_s27 = sld [smem:[#allocation23_spill]]  ;;  %s6084_s28 = sld [smem:[#allocation21_spill]] }
 0xbe0   : > { %s6085_s26 = sld [smem:[#allocation24_spill]]  ;;  %s6086_s24 = smov %s5203_s25 }
 0xbe5   : > { %p31_p9 = scmp.ge.s32.totalorder %s6083_s27, 4   ;;  %s6087_s25 = smov %s6084_s28 }
 0xbe7   :  { %33 = sbr.rel (!%p31_p9) target bundleno = 17 (0x11), region = 167 }
 0xbee   :  { %3734 = vsyncpa [#allocation3], 1 }
 0xbef   :  { %3736 = vsyncpa [#allocation3 + $0x1], 1 }
 0xbf0   :  { %3737 = vsyncpa [#allocation6], 1 }
 0xbf1   :  { %3738 = vsyncpa [#allocation9], 1 }
 0xbf2   :  { %3739 = vsyncpa [#allocation12], 1 }
 0xbf3   :  { %3740 = vsyncpa [#allocation4], 1 }
 0xbf4   :  { %3742 = vsyncpa [#allocation4 + $0x1], 1 }

</bundles_post_ra>
